<compile_context>
chip_gen: v6e
topology: v6e:2x2x1
jax: 0.10.0
libtpu: 0.0.40
codegen_flags: <defaults>
</compile_context>

<pallas_src>
import numpy as np
import jax
import jax.numpy as jnp
from jax.experimental import pallas as pl
from jax.experimental.pallas import tpu as pltpu


# ----------------------------------------------------------------------------
# Kernel
# ----------------------------------------------------------------------------
def rnn_encoder_kernel(lens_ref, xf_ref, xb_ref,
                       wih_f_ref, wih_b_ref, b_f_ref, b_b_ref,
                       whh_f_ref, whh_b_ref,
                       wrh_ref, brh_ref, wrc_ref, brc_ref,
                       outf_ref, outb_ref, newh_ref, newc_ref,
                       ginf_ref, ginb_ref,
                       hf_ref, cf_ref, hb_ref, cb_ref):
    """One (batch chunk, time chunk) step of the bidirectional LSTM.

    xf_ref / xb_ref : [Tc*bb, D] bf16  time-major flattened fwd / bwd chunks
    ginf/ginb_ref   : [Tc*bb, 4H] f32  scratch: precomputed input gates (chunk)
    outf/outb_ref   : [Tc, bb, H] bf16 per-direction sequence output (chunk)
    hf/cf/hb/cb_ref : [bb, H] f32      carried LSTM state (persists across chunks)
    """
    k = pl.program_id(1)
    nT = pl.num_programs(1)
    Tc, bb, H = outf_ref.shape

    lens = lens_ref[...]                       # [bb, 1] int32
    whh_f = whh_f_ref[...]                     # [H, 4H] bf16
    whh_b = whh_b_ref[...]
    b_f = b_f_ref[...]                         # [1, 4H] f32
    b_b = b_b_ref[...]

    # ---- hoisted input projection for this chunk (one MXU matmul / direction)
    ginf_ref[...] = jnp.dot(xf_ref[...], wih_f_ref[...],
                            preferred_element_type=jnp.float32)
    ginb_ref[...] = jnp.dot(xb_ref[...], wih_b_ref[...],
                            preferred_element_type=jnp.float32)

    # ---- (re)initialize carried state at the start of each sequence sweep ---
    @pl.when(k == 0)
    def _init():
        z = jnp.zeros((bb, H), jnp.float32)
        hf_ref[...] = z
        cf_ref[...] = z
        hb_ref[...] = z
        cb_ref[...] = z

    def sigmoid(x):
        # Exact identity sigmoid(x) = 0.5*(1 + tanh(x/2)); tanh lives on the EUP
        # slot, so no VPU divide sits on the serial recurrence chain.
        return 0.5 * (jnp.tanh(0.5 * x) + 1.0)

    def cell(gates, c):
        # PyTorch LSTM gate order: i, f, g, o.  For H % 128 == 0 these slices
        # are whole-vreg (no relayout); gate math stays in f32.
        i = sigmoid(gates[:, 0 * H:1 * H])
        f = sigmoid(gates[:, 1 * H:2 * H])
        g = jnp.tanh(gates[:, 2 * H:3 * H])
        o = sigmoid(gates[:, 3 * H:4 * H])
        c_new = f * c + i * g
        h_new = o * jnp.tanh(c_new)
        return h_new, c_new

    t0_f = k * Tc                 # first global time of the forward chunk
    t0_b = (nT - 1 - k) * Tc      # first global time of the backward chunk

    # ---- fused fwd+bwd recurrence over this chunk --------------------------
    def step(s, carry):
        h_f, c_f, h_b, c_b = carry

        # forward: global time t0_f + s
        rf = pl.multiple_of(s * bb, bb)
        gates_f = (ginf_ref[pl.ds(rf, bb), :] + b_f
                   + jnp.dot(h_f.astype(jnp.bfloat16), whh_f,
                             preferred_element_type=jnp.float32))
        hf_new, cf_new = cell(gates_f, c_f)
        vf = (t0_f + s) < lens                               # [bb, 1] bool
        outf_ref[s] = jnp.where(vf, hf_new, 0.0).astype(outf_ref.dtype)
        h_f = jnp.where(vf, hf_new, h_f)
        c_f = jnp.where(vf, cf_new, c_f)

        # backward: global time t0_b + (Tc - 1 - s)  (descending within chunk)
        sl = Tc - 1 - s
        rb = pl.multiple_of(sl * bb, bb)
        gates_b = (ginb_ref[pl.ds(rb, bb), :] + b_b
                   + jnp.dot(h_b.astype(jnp.bfloat16), whh_b,
                             preferred_element_type=jnp.float32))
        hb_new, cb_new = cell(gates_b, c_b)
        vb = (t0_b + sl) < lens
        outb_ref[sl] = jnp.where(vb, hb_new, 0.0).astype(outb_ref.dtype)
        h_b = jnp.where(vb, hb_new, h_b)
        c_b = jnp.where(vb, cb_new, c_b)
        return h_f, c_f, h_b, c_b

    h_f, c_f, h_b, c_b = jax.lax.fori_loop(
        0, Tc, step, (hf_ref[...], cf_ref[...], hb_ref[...], cb_ref[...]))

    # persist carried state for the next time chunk
    hf_ref[...] = h_f
    cf_ref[...] = c_f
    hb_ref[...] = h_b
    cb_ref[...] = c_b

    # ---- reduce_h_W / reduce_c_W on the final states (last time chunk only) -
    # Split dots instead of lane-concat; default precision (inputs are already
    # bf16-rounded through the recurrence, HIGHEST would be wasted passes).
    @pl.when(k == nT - 1)
    def _finalize():
        newh_ref[...] = (
            jnp.dot(h_f, wrh_ref[0:H, :], preferred_element_type=jnp.float32)
            + jnp.dot(h_b, wrh_ref[H:2 * H, :], preferred_element_type=jnp.float32)
            + brh_ref[...])
        newc_ref[...] = (
            jnp.dot(c_f, wrc_ref[0:H, :], preferred_element_type=jnp.float32)
            + jnp.dot(c_b, wrc_ref[H:2 * H, :], preferred_element_type=jnp.float32)
            + brc_ref[...])


# ----------------------------------------------------------------------------
# Parameters
# ----------------------------------------------------------------------------
def init_raw_params(key, input_dim, hidden):
    ks = jax.random.split(key, 10)
    scale = 0.1

    def norm(k, shape):
        return scale * jax.random.normal(k, shape, jnp.float32)

    return dict(
        wih_f=norm(ks[0], (input_dim, 4 * hidden)),   # W_ih (fwd), pre-transposed
        whh_f=norm(ks[1], (hidden, 4 * hidden)),      # W_hh (fwd), pre-transposed
        b_f=norm(ks[2], (1, 4 * hidden)),             # bias_ih + bias_hh (fwd)
        wih_b=norm(ks[3], (input_dim, 4 * hidden)),   # backward direction
        whh_b=norm(ks[4], (hidden, 4 * hidden)),
        b_b=norm(ks[5], (1, 4 * hidden)),
        wrh=norm(ks[6], (2 * hidden, hidden)),        # reduce_h_W.weight^T
        brh=norm(ks[7], (1, hidden)),
        wrc=norm(ks[8], (2 * hidden, hidden)),        # reduce_c_W.weight^T
        brc=norm(ks[9], (1, hidden)),
    )


def pack_params(raw):
    """bf16 weights for the MXU matmuls; biases and reduce linears stay f32."""
    return dict(
        wih_f=raw["wih_f"].astype(jnp.bfloat16),
        wih_b=raw["wih_b"].astype(jnp.bfloat16),
        b_f=raw["b_f"].astype(jnp.float32),
        b_b=raw["b_b"].astype(jnp.float32),
        whh_f=raw["whh_f"].astype(jnp.bfloat16),
        whh_b=raw["whh_b"].astype(jnp.bfloat16),
        wrh=raw["wrh"], brh=raw["brh"], wrc=raw["wrc"], brc=raw["brc"],
    )


# ----------------------------------------------------------------------------
# Wrapper helpers
# ----------------------------------------------------------------------------
def _pick_bb(B):
    # Largest batch-chunk up to 256 that divides B (fills the MXU rows at
    # production sizes; keeps nc — the serial-per-TC grid extent — minimal).
    for cand in (256, 128, 64, 32, 16, 8):
        if B % cand == 0:
            return cand
    return B


def _largest_divisor_leq(n, cap):
    for d in range(min(n, cap), 0, -1):
        if n % d == 0:
            return d
    return n


def _vmem_limit_bytes():
    # ~96 MiB on v5e/v6e (128 MiB physical), ~48 MiB on v7x (64 MiB physical).
    try:
        cap = getattr(pltpu.get_tpu_info(), "vmem_capacity_bytes", None)
        if cap:
            return int(min(cap * 3 // 4, 96 * 1024 * 1024))
    except Exception:
        pass
    return 48 * 1024 * 1024


# ----------------------------------------------------------------------------
# Wrapper (mirrors RNNEncoder.forward, bidirect=True)
# ----------------------------------------------------------------------------
def rnn_encoder_forward(embedded_words, input_lens, packed, hidden,
                        max_len=None, bb=None, t_chunk=None):
    """embedded_words: [B, T, D] f32, input_lens: [B] int32 (lens >= 1).

    Returns (output [B, max_len, 2H], context_mask [B, max_len] int32,
             (new_h [B, H], new_c [B, H])).
    Pass max_len as a static int to avoid a host sync.
    """
    B, T, D = embedded_words.shape
    H = hidden

    if bb is None:
        bb = _pick_bb(B)
    assert B % bb == 0
    nc = B // bb

    if t_chunk is None:
        t_chunk = _largest_divisor_leq(T, 64)
    Tc = t_chunk
    assert T % Tc == 0
    nT = T // Tc

    # One-time layout prep (XLA): chunk batch, time-major flatten, cast to bf16.
    x_c = (embedded_words.astype(jnp.bfloat16)
           .reshape(nc, bb, T, D).transpose(0, 2, 1, 3).reshape(nc, T * bb, D))
    lens_c = input_lens.astype(jnp.int32).reshape(nc, bb, 1)

    def full(a):
        return pl.BlockSpec(a.shape, lambda c, k, nd=a.ndim: (0,) * nd)

    out_f, out_b, newh3, newc3 = pl.pallas_call(
        rnn_encoder_kernel,
        out_shape=(
            jax.ShapeDtypeStruct((nc, T, bb, H), jnp.bfloat16),   # fwd outputs
            jax.ShapeDtypeStruct((nc, T, bb, H), jnp.bfloat16),   # bwd outputs
            jax.ShapeDtypeStruct((nc, bb, H), jnp.float32),       # new_h
            jax.ShapeDtypeStruct((nc, bb, H), jnp.float32),       # new_c
        ),
        grid=(nc, nT),
        in_specs=[
            pl.BlockSpec((None, bb, 1), lambda c, k: (c, 0, 0)),            # lens
            pl.BlockSpec((None, Tc * bb, D), lambda c, k: (c, k, 0)),       # x fwd chunk
            pl.BlockSpec((None, Tc * bb, D), lambda c, k: (c, nT - 1 - k, 0)),  # x bwd chunk
            full(packed["wih_f"]), full(packed["wih_b"]),
            full(packed["b_f"]), full(packed["b_b"]),
            full(packed["whh_f"]), full(packed["whh_b"]),
            full(packed["wrh"]), full(packed["brh"]),
            full(packed["wrc"]), full(packed["brc"]),
        ],
        out_specs=(
            pl.BlockSpec((None, Tc, bb, H), lambda c, k: (c, k, 0, 0)),
            pl.BlockSpec((None, Tc, bb, H), lambda c, k: (c, nT - 1 - k, 0, 0)),
            pl.BlockSpec((None, bb, H), lambda c, k: (c, 0, 0)),
            pl.BlockSpec((None, bb, H), lambda c, k: (c, 0, 0)),
        ),
        scratch_shapes=[
            pltpu.VMEM((Tc * bb, 4 * H), jnp.float32),   # gin fwd (chunk only)
            pltpu.VMEM((Tc * bb, 4 * H), jnp.float32),   # gin bwd (chunk only)
            pltpu.VMEM((bb, H), jnp.float32),            # h_f carried state
            pltpu.VMEM((bb, H), jnp.float32),            # c_f
            pltpu.VMEM((bb, H), jnp.float32),            # h_b
            pltpu.VMEM((bb, H), jnp.float32),            # c_b
        ],
        compiler_params=pltpu.CompilerParams(
            dimension_semantics=("parallel", "arbitrary"),
            vmem_limit_bytes=_vmem_limit_bytes(),
        ),
    )(lens_c, x_c, x_c,
      packed["wih_f"], packed["wih_b"], packed["b_f"], packed["b_b"],
      packed["whh_f"], packed["whh_b"],
      packed["wrh"], packed["brh"], packed["wrc"], packed["brc"])

    # Reassemble to the PyTorch [B, T, 2H] convention.  Output from the kernel
    # is bf16, so this single layout pass reads half the bytes of an f32 pass.
    out = jnp.concatenate([out_f, out_b], axis=-1)            # [nc, T, bb, 2H]
    output = out.transpose(0, 2, 1, 3).reshape(B, T, 2 * H).astype(jnp.float32)

    # Context mask depends only on input_lens -> computed in XLA, not the kernel.
    mask = (jnp.arange(T, dtype=jnp.int32)[None, :]
            < input_lens.astype(jnp.int32)[:, None]).astype(jnp.int32)

    new_h = newh3.reshape(B, H)
    new_c = newc3.reshape(B, H)

    if max_len is None:
        # pad_packed_sequence trims to max(input_lens); prefer a static max_len
        # to avoid this host sync.
        max_len = int(jax.device_get(jnp.max(input_lens)))
    return output[:, :max_len], mask[:, :max_len], (new_h, new_c)


# ----------------------------------------------------------------------------
# Plain-JAX reference with matching numerics (bf16 gate matmuls, f32 accum)
# ----------------------------------------------------------------------------
def rnn_encoder_reference(x, input_lens, raw, hidden):
    B, T, D = x.shape
    H = hidden
    lens2 = input_lens.reshape(B, 1).astype(jnp.int32)
    xb = x.astype(jnp.bfloat16)

    def run(wih, whh, b, reverse):
        wih = wih.astype(jnp.bfloat16)
        whh = whh.astype(jnp.bfloat16)
        h = jnp.zeros((B, H), jnp.float32)
        c = jnp.zeros((B, H), jnp.float32)
        outs = [None] * T
        order = range(T - 1, -1, -1) if reverse else range(T)
        for t in order:
            gates = (jnp.dot(xb[:, t, :], wih, preferred_element_type=jnp.float32)
                     + jnp.dot(h.astype(jnp.bfloat16), whh,
                               preferred_element_type=jnp.float32) + b)
            i = jax.nn.sigmoid(gates[:, :H])
            f = jax.nn.sigmoid(gates[:, H:2 * H])
            g = jnp.tanh(gates[:, 2 * H:3 * H])
            o = jax.nn.sigmoid(gates[:, 3 * H:])
            c_new = f * c + i * g
            h_new = o * jnp.tanh(c_new)
            valid = t < lens2
            outs[t] = jnp.where(valid, h_new, 0.0)
            h = jnp.where(valid, h_new, h)
            c = jnp.where(valid, c_new, c)
        return jnp.stack(outs, axis=1), h, c

    of, hf, cf = run(raw["wih_f"], raw["whh_f"], raw["b_f"], False)
    ob, hb, cb = run(raw["wih_b"], raw["whh_b"], raw["b_b"], True)
    out = jnp.concatenate([of, ob], axis=-1)
    new_h = jnp.dot(jnp.concatenate([hf, hb], 1), raw["wrh"]) + raw["brh"]
    new_c = jnp.dot(jnp.concatenate([cf, cb], 1), raw["wrc"]) + raw["brc"]
    mask = (jnp.arange(T)[None, :] < lens2).astype(jnp.int32)
    max_len = int(np.max(np.asarray(input_lens)))
    return out[:, :max_len], mask[:, :max_len], (new_h, new_c)


if __name__ == "__main__":
    B, T, D, H = 2, 8, 16, 32          # batch, seq len, input_emb_dim, hidden_size
    key = jax.random.PRNGKey(0)
    kx, kp = jax.random.split(key)
    x = jax.random.normal(kx, (B, T, D), jnp.float32)
    input_lens = jnp.array([8, 5], jnp.int32)
    max_len = 8                        # static: avoids host sync in forward

    raw = init_raw_params(kp, D, H)
    packed = pack_params(raw)

    # t_chunk=4 exercises the T-chunk pipeline (2 chunks) even at demo sizes.
    out, mask, (new_h, new_c) = rnn_encoder_forward(
        x, input_lens, packed, H, max_len=max_len, t_chunk=4)
    jax.block_until_ready((out, mask, new_h, new_c))

    # Validate against the plain-JAX reference (same bf16 gate numerics).
    r_out, r_mask, (r_h, r_c) = rnn_encoder_reference(x, input_lens, raw, H)
    np.testing.assert_allclose(np.asarray(out), np.asarray(r_out), atol=1e-2, rtol=1e-2)
    np.testing.assert_array_equal(np.asarray(mask), np.asarray(r_mask))
    np.testing.assert_allclose(np.asarray(new_h), np.asarray(r_h), atol=1e-2, rtol=1e-2)
    np.testing.assert_allclose(np.asarray(new_c), np.asarray(r_c), atol=1e-2, rtol=1e-2)

    print("KERNEL_OK")
</pallas_src>

<mosaic_0001>
module attributes {stable_mosaic.version = 11 : i64} {
  func.func @rnn_encoder_kernel(%arg0: i32, %arg1: i32, %arg2: memref<1x2x1xi32, #tpu.memory_space<vmem>>, %arg3: memref<1x8x16xbf16, #tpu.memory_space<vmem>>, %arg4: memref<1x8x16xbf16, #tpu.memory_space<vmem>>, %arg5: memref<16x128xbf16, #tpu.memory_space<vmem>>, %arg6: memref<16x128xbf16, #tpu.memory_space<vmem>>, %arg7: memref<1x128xf32, #tpu.memory_space<vmem>>, %arg8: memref<1x128xf32, #tpu.memory_space<vmem>>, %arg9: memref<32x128xbf16, #tpu.memory_space<vmem>>, %arg10: memref<32x128xbf16, #tpu.memory_space<vmem>>, %arg11: memref<64x32xf32, #tpu.memory_space<vmem>>, %arg12: memref<1x32xf32, #tpu.memory_space<vmem>>, %arg13: memref<64x32xf32, #tpu.memory_space<vmem>>, %arg14: memref<1x32xf32, #tpu.memory_space<vmem>>, %arg15: memref<1x4x2x32xbf16, #tpu.memory_space<vmem>>, %arg16: memref<1x4x2x32xbf16, #tpu.memory_space<vmem>>, %arg17: memref<1x2x32xf32, #tpu.memory_space<vmem>>, %arg18: memref<1x2x32xf32, #tpu.memory_space<vmem>>, %arg19: memref<8x128xf32, #tpu.memory_space<vmem>>, %arg20: memref<8x128xf32, #tpu.memory_space<vmem>>, %arg21: memref<2x32xf32, #tpu.memory_space<vmem>>, %arg22: memref<2x32xf32, #tpu.memory_space<vmem>>, %arg23: memref<2x32xf32, #tpu.memory_space<vmem>>, %arg24: memref<2x32xf32, #tpu.memory_space<vmem>>) attributes {dimension_semantics = [#tpu.dimension_semantics<parallel>, #tpu.dimension_semantics<arbitrary>], iteration_bounds = array<i64: 1, 2>, scalar_prefetch = 0 : i64, scratch_operands = 6 : i64, tpu.core_type = #tpu.core_type<tc>, window_params = [{transform_indices = @transform_0, window_bounds = array<i64: 1, 2, 1>}, {transform_indices = @transform_1, window_bounds = array<i64: 1, 8, 16>}, {transform_indices = @transform_2, window_bounds = array<i64: 1, 8, 16>}, {pipeline_mode = #tpu.pipeline_mode<synchronous>, transform_indices = @transform_3, window_bounds = array<i64: 16, 128>}, {pipeline_mode = #tpu.pipeline_mode<synchronous>, transform_indices = @transform_4, window_bounds = array<i64: 16, 128>}, {pipeline_mode = #tpu.pipeline_mode<synchronous>, transform_indices = @transform_5, window_bounds = array<i64: 1, 128>}, {pipeline_mode = #tpu.pipeline_mode<synchronous>, transform_indices = @transform_6, window_bounds = array<i64: 1, 128>}, {pipeline_mode = #tpu.pipeline_mode<synchronous>, transform_indices = @transform_7, window_bounds = array<i64: 32, 128>}, {pipeline_mode = #tpu.pipeline_mode<synchronous>, transform_indices = @transform_8, window_bounds = array<i64: 32, 128>}, {pipeline_mode = #tpu.pipeline_mode<synchronous>, transform_indices = @transform_9, window_bounds = array<i64: 64, 32>}, {pipeline_mode = #tpu.pipeline_mode<synchronous>, transform_indices = @transform_10, window_bounds = array<i64: 1, 32>}, {pipeline_mode = #tpu.pipeline_mode<synchronous>, transform_indices = @transform_11, window_bounds = array<i64: 64, 32>}, {pipeline_mode = #tpu.pipeline_mode<synchronous>, transform_indices = @transform_12, window_bounds = array<i64: 1, 32>}, {transform_indices = @transform_13, window_bounds = array<i64: 1, 4, 2, 32>}, {transform_indices = @transform_14, window_bounds = array<i64: 1, 4, 2, 32>}, {transform_indices = @transform_15, window_bounds = array<i64: 1, 2, 32>}, {transform_indices = @transform_16, window_bounds = array<i64: 1, 2, 32>}]} {
    %c0 = arith.constant 0 : index
    %c0_0 = arith.constant 0 : index
    %c0_1 = arith.constant 0 : index
    %0 = vector.load %arg2[%c0, %c0_0, %c0_1] : memref<1x2x1xi32, #tpu.memory_space<vmem>>, vector<1x2x1xi32>
    %1 = vector.shape_cast %0 : vector<1x2x1xi32> to vector<2x1xi32>
    %c0_2 = arith.constant 0 : index
    %c0_3 = arith.constant 0 : index
    %2 = vector.load %arg9[%c0_2, %c0_3] : memref<32x128xbf16, #tpu.memory_space<vmem>>, vector<32x128xbf16>
    %c0_4 = arith.constant 0 : index
    %c0_5 = arith.constant 0 : index
    %3 = vector.load %arg10[%c0_4, %c0_5] : memref<32x128xbf16, #tpu.memory_space<vmem>>, vector<32x128xbf16>
    %c0_6 = arith.constant 0 : index
    %c0_7 = arith.constant 0 : index
    %4 = vector.load %arg7[%c0_6, %c0_7] : memref<1x128xf32, #tpu.memory_space<vmem>>, vector<1x128xf32>
    %c0_8 = arith.constant 0 : index
    %c0_9 = arith.constant 0 : index
    %5 = vector.load %arg8[%c0_8, %c0_9] : memref<1x128xf32, #tpu.memory_space<vmem>>, vector<1x128xf32>
    %c0_10 = arith.constant 0 : index
    %c0_11 = arith.constant 0 : index
    %c0_12 = arith.constant 0 : index
    %6 = vector.load %arg3[%c0_10, %c0_11, %c0_12] : memref<1x8x16xbf16, #tpu.memory_space<vmem>>, vector<1x8x16xbf16>
    %7 = vector.shape_cast %6 : vector<1x8x16xbf16> to vector<8x16xbf16>
    %c0_13 = arith.constant 0 : index
    %c0_14 = arith.constant 0 : index
    %8 = vector.load %arg5[%c0_13, %c0_14] : memref<16x128xbf16, #tpu.memory_space<vmem>>, vector<16x128xbf16>
    %cst = arith.constant dense<0.000000e+00> : vector<8x128xf32>
    %9 = tpu.matmul %7, %8, %cst {dimension_numbers = #tpu.dot_dimension_numbers<[1], [0], [0], [1], [0, 0, 1, 1], [], []>} : vector<8x16xbf16>, vector<16x128xbf16>, vector<8x128xf32> -> vector<8x128xf32>
    %c0_15 = arith.constant 0 : index
    %c0_16 = arith.constant 0 : index
    %10 = vector.load %arg19[%c0_15, %c0_16] : memref<8x128xf32, #tpu.memory_space<vmem>>, vector<8x128xf32>
    tpu.vector_store %arg19[%c0_15, %c0_16], %9 {strides = array<i32>} : memref<8x128xf32, #tpu.memory_space<vmem>>, vector<8x128xf32>,
    %c0_17 = arith.constant 0 : index
    %c0_18 = arith.constant 0 : index
    %c0_19 = arith.constant 0 : index
    %11 = vector.load %arg4[%c0_17, %c0_18, %c0_19] : memref<1x8x16xbf16, #tpu.memory_space<vmem>>, vector<1x8x16xbf16>
    %12 = vector.shape_cast %11 : vector<1x8x16xbf16> to vector<8x16xbf16>
    %c0_20 = arith.constant 0 : index
    %c0_21 = arith.constant 0 : index
    %13 = vector.load %arg6[%c0_20, %c0_21] : memref<16x128xbf16, #tpu.memory_space<vmem>>, vector<16x128xbf16>
    %cst_22 = arith.constant dense<0.000000e+00> : vector<8x128xf32>
    %14 = tpu.matmul %12, %13, %cst_22 {dimension_numbers = #tpu.dot_dimension_numbers<[1], [0], [0], [1], [0, 0, 1, 1], [], []>} : vector<8x16xbf16>, vector<16x128xbf16>, vector<8x128xf32> -> vector<8x128xf32>
    %c0_23 = arith.constant 0 : index
    %c0_24 = arith.constant 0 : index
    %15 = vector.load %arg20[%c0_23, %c0_24] : memref<8x128xf32, #tpu.memory_space<vmem>>, vector<8x128xf32>
    tpu.vector_store %arg20[%c0_23, %c0_24], %14 {strides = array<i32>} : memref<8x128xf32, #tpu.memory_space<vmem>>, vector<8x128xf32>,
    %c0_i32 = arith.constant 0 : i32
    %16 = arith.cmpi eq, %arg1, %c0_i32 : i32
    %17 = arith.extui %16 : i1 to i32
    %c0_i32_25 = arith.constant 0 : i32
    %18 = arith.cmpi ne, %17, %c0_i32_25 : i32
    scf.if %18 {
      %cst_49 = arith.constant 0.000000e+00 : f32
      %35 = vector.broadcast %cst_49 : f32 to vector<2x32xf32>
      %c0_50 = arith.constant 0 : index
      %c0_51 = arith.constant 0 : index
      %36 = vector.load %arg21[%c0_50, %c0_51] : memref<2x32xf32, #tpu.memory_space<vmem>>, vector<2x32xf32>
      tpu.vector_store %arg21[%c0_50, %c0_51], %35 {strides = array<i32>} : memref<2x32xf32, #tpu.memory_space<vmem>>, vector<2x32xf32>,
      %c0_52 = arith.constant 0 : index
      %c0_53 = arith.constant 0 : index
      %37 = vector.load %arg22[%c0_52, %c0_53] : memref<2x32xf32, #tpu.memory_space<vmem>>, vector<2x32xf32>
      tpu.vector_store %arg22[%c0_52, %c0_53], %35 {strides = array<i32>} : memref<2x32xf32, #tpu.memory_space<vmem>>, vector<2x32xf32>,
      %c0_54 = arith.constant 0 : index
      %c0_55 = arith.constant 0 : index
      %38 = vector.load %arg23[%c0_54, %c0_55] : memref<2x32xf32, #tpu.memory_space<vmem>>, vector<2x32xf32>
      tpu.vector_store %arg23[%c0_54, %c0_55], %35 {strides = array<i32>} : memref<2x32xf32, #tpu.memory_space<vmem>>, vector<2x32xf32>,
      %c0_56 = arith.constant 0 : index
      %c0_57 = arith.constant 0 : index
      %39 = vector.load %arg24[%c0_56, %c0_57] : memref<2x32xf32, #tpu.memory_space<vmem>>, vector<2x32xf32>
      tpu.vector_store %arg24[%c0_56, %c0_57], %35 {strides = array<i32>} : memref<2x32xf32, #tpu.memory_space<vmem>>, vector<2x32xf32>,
    } else {
    }
    %c4_i32 = arith.constant 4 : i32
    %19 = arith.muli %arg1, %c4_i32 : i32
    %c1_i32 = arith.constant 1 : i32
    %20 = arith.subi %c1_i32, %arg1 : i32
    %c4_i32_26 = arith.constant 4 : i32
    %21 = arith.muli %20, %c4_i32_26 : i32
    %c0_27 = arith.constant 0 : index
    %c0_28 = arith.constant 0 : index
    %22 = vector.load %arg21[%c0_27, %c0_28] : memref<2x32xf32, #tpu.memory_space<vmem>>, vector<2x32xf32>
    %c0_29 = arith.constant 0 : index
    %c0_30 = arith.constant 0 : index
    %23 = vector.load %arg22[%c0_29, %c0_30] : memref<2x32xf32, #tpu.memory_space<vmem>>, vector<2x32xf32>
    %c0_31 = arith.constant 0 : index
    %c0_32 = arith.constant 0 : index
    %24 = vector.load %arg23[%c0_31, %c0_32] : memref<2x32xf32, #tpu.memory_space<vmem>>, vector<2x32xf32>
    %c0_33 = arith.constant 0 : index
    %c0_34 = arith.constant 0 : index
    %25 = vector.load %arg24[%c0_33, %c0_34] : memref<2x32xf32, #tpu.memory_space<vmem>>, vector<2x32xf32>
    %c0_i32_35 = arith.constant 0 : i32
    %c4_i32_36 = arith.constant 4 : i32
    %26 = arith.addi %c0_i32_35, %c4_i32_36 : i32
    %c1_i32_37 = arith.constant 1 : i32
    %27:4 = scf.for %arg25 = %c0_i32_35 to %26 step %c1_i32_37 iter_args(%arg26 = %22, %arg27 = %23, %arg28 = %24, %arg29 = %25) -> (vector<2x32xf32>, vector<2x32xf32>, vector<2x32xf32>, vector<2x32xf32>)  : i32 {
      %c2_i32 = arith.constant 2 : i32
      %35 = arith.muli %arg25, %c2_i32 : i32
      %36 = tpu.assume_multiple %35, 2 : i32
      %37 = arith.index_cast %36 : i32 to index
      %c0_49 = arith.constant 0 : index
      %38 = vector.load %arg19[%37, %c0_49] : memref<8x128xf32, #tpu.memory_space<vmem>>, vector<2x128xf32>
      %39 = vector.broadcast %4 : vector<1x128xf32> to vector<2x128xf32>
      %40 = arith.addf %38, %39 : vector<2x128xf32>
      %41 = arith.truncf %arg26 : vector<2x32xf32> to vector<2x32xbf16>
      %cst_50 = arith.constant dense<0.000000e+00> : vector<2x128xf32>
      %42 = tpu.matmul %41, %2, %cst_50 {dimension_numbers = #tpu.dot_dimension_numbers<[1], [0], [0], [1], [0, 0, 1, 1], [], []>} : vector<2x32xbf16>, vector<32x128xbf16>, vector<2x128xf32> -> vector<2x128xf32>
      %43 = arith.addf %40, %42 : vector<2x128xf32>
      %44 = vector.extract_strided_slice %43 {offsets = [0, 0], sizes = [2, 32], strides = [1, 1]} : vector<2x128xf32> to vector<2x32xf32>
      %cst_51 = arith.constant 5.000000e-01 : f32
      %45 = vector.broadcast %cst_51 : f32 to vector<2x32xf32>
      %46 = arith.mulf %45, %44 : vector<2x32xf32>
      %47 = math.tanh %46 : vector<2x32xf32>
      %cst_52 = arith.constant 1.000000e+00 : f32
      %48 = vector.broadcast %cst_52 : f32 to vector<2x32xf32>
      %49 = arith.addf %47, %48 : vector<2x32xf32>
      %cst_53 = arith.constant 5.000000e-01 : f32
      %50 = vector.broadcast %cst_53 : f32 to vector<2x32xf32>
      %51 = arith.mulf %50, %49 : vector<2x32xf32>
      %52 = vector.extract_strided_slice %43 {offsets = [0, 32], sizes = [2, 32], strides = [1, 1]} : vector<2x128xf32> to vector<2x32xf32>
      %cst_54 = arith.constant 5.000000e-01 : f32
      %53 = vector.broadcast %cst_54 : f32 to vector<2x32xf32>
      %54 = arith.mulf %53, %52 : vector<2x32xf32>
      %55 = math.tanh %54 : vector<2x32xf32>
      %cst_55 = arith.constant 1.000000e+00 : f32
      %56 = vector.broadcast %cst_55 : f32 to vector<2x32xf32>
      %57 = arith.addf %55, %56 : vector<2x32xf32>
      %cst_56 = arith.constant 5.000000e-01 : f32
      %58 = vector.broadcast %cst_56 : f32 to vector<2x32xf32>
      %59 = arith.mulf %58, %57 : vector<2x32xf32>
      %60 = vector.extract_strided_slice %43 {offsets = [0, 64], sizes = [2, 32], strides = [1, 1]} : vector<2x128xf32> to vector<2x32xf32>
      %61 = math.tanh %60 : vector<2x32xf32>
      %62 = vector.extract_strided_slice %43 {offsets = [0, 96], sizes = [2, 32], strides = [1, 1]} : vector<2x128xf32> to vector<2x32xf32>
      %cst_57 = arith.constant 5.000000e-01 : f32
      %63 = vector.broadcast %cst_57 : f32 to vector<2x32xf32>
      %64 = arith.mulf %63, %62 : vector<2x32xf32>
      %65 = math.tanh %64 : vector<2x32xf32>
      %cst_58 = arith.constant 1.000000e+00 : f32
      %66 = vector.broadcast %cst_58 : f32 to vector<2x32xf32>
      %67 = arith.addf %65, %66 : vector<2x32xf32>
      %cst_59 = arith.constant 5.000000e-01 : f32
      %68 = vector.broadcast %cst_59 : f32 to vector<2x32xf32>
      %69 = arith.mulf %68, %67 : vector<2x32xf32>
      %70 = arith.mulf %59, %arg27 : vector<2x32xf32>
      %71 = arith.mulf %51, %61 : vector<2x32xf32>
      %72 = arith.addf %70, %71 : vector<2x32xf32>
      %73 = math.tanh %72 : vector<2x32xf32>
      %74 = arith.mulf %69, %73 : vector<2x32xf32>
      %75 = arith.addi %19, %arg25 : i32
      %76 = vector.broadcast %75 : i32 to vector<2x1xi32>
      %77 = arith.cmpi slt, %76, %1 : vector<2x1xi32>
      %cst_60 = arith.constant 0.000000e+00 : f32
      %78 = vector.shape_cast %77 : vector<2x1xi1> to vector<2x1xi1>
      %79 = vector.broadcast %78 : vector<2x1xi1> to vector<2x32xi1>
      %80 = vector.broadcast %cst_60 : f32 to vector<2x32xf32>
      %81 = arith.select %79, %74, %80 : vector<2x32xi1>, vector<2x32xf32>
      %82 = arith.truncf %81 : vector<2x32xf32> to vector<2x32xbf16>
      %c0_61 = arith.constant 0 : index
      %83 = arith.index_cast %arg25 : i32 to index
      %c0_62 = arith.constant 0 : index
      %c0_63 = arith.constant 0 : index
      %84 = vector.load %arg15[%c0_61, %83, %c0_62, %c0_63] : memref<1x4x2x32xbf16, #tpu.memory_space<vmem>>, vector<1x1x2x32xbf16>
      %85 = vector.shape_cast %84 : vector<1x1x2x32xbf16> to vector<2x32xbf16>
      %86 = vector.shape_cast %82 : vector<2x32xbf16> to vector<1x1x2x32xbf16>
      tpu.vector_store %arg15[%c0_61, %83, %c0_62, %c0_63], %86 {strides = array<i32>} : memref<1x4x2x32xbf16, #tpu.memory_space<vmem>>, vector<1x1x2x32xbf16>,
      %87 = vector.shape_cast %77 : vector<2x1xi1> to vector<2x1xi1>
      %88 = vector.broadcast %87 : vector<2x1xi1> to vector<2x32xi1>
      %89 = arith.select %88, %74, %arg26 : vector<2x32xi1>, vector<2x32xf32>
      %90 = vector.shape_cast %77 : vector<2x1xi1> to vector<2x1xi1>
      %91 = vector.broadcast %90 : vector<2x1xi1> to vector<2x32xi1>
      %92 = arith.select %91, %72, %arg27 : vector<2x32xi1>, vector<2x32xf32>
      %c3_i32 = arith.constant 3 : i32
      %93 = arith.subi %c3_i32, %arg25 : i32
      %c2_i32_64 = arith.constant 2 : i32
      %94 = arith.muli %93, %c2_i32_64 : i32
      %95 = tpu.assume_multiple %94, 2 : i32
      %96 = arith.index_cast %95 : i32 to index
      %c0_65 = arith.constant 0 : index
      %97 = vector.load %arg20[%96, %c0_65] : memref<8x128xf32, #tpu.memory_space<vmem>>, vector<2x128xf32>
      %98 = vector.broadcast %5 : vector<1x128xf32> to vector<2x128xf32>
      %99 = arith.addf %97, %98 : vector<2x128xf32>
      %100 = arith.truncf %arg28 : vector<2x32xf32> to vector<2x32xbf16>
      %cst_66 = arith.constant dense<0.000000e+00> : vector<2x128xf32>
      %101 = tpu.matmul %100, %3, %cst_66 {dimension_numbers = #tpu.dot_dimension_numbers<[1], [0], [0], [1], [0, 0, 1, 1], [], []>} : vector<2x32xbf16>, vector<32x128xbf16>, vector<2x128xf32> -> vector<2x128xf32>
      %102 = arith.addf %99, %101 : vector<2x128xf32>
      %103 = vector.extract_strided_slice %102 {offsets = [0, 0], sizes = [2, 32], strides = [1, 1]} : vector<2x128xf32> to vector<2x32xf32>
      %cst_67 = arith.constant 5.000000e-01 : f32
      %104 = vector.broadcast %cst_67 : f32 to vector<2x32xf32>
      %105 = arith.mulf %104, %103 : vector<2x32xf32>
      %106 = math.tanh %105 : vector<2x32xf32>
      %cst_68 = arith.constant 1.000000e+00 : f32
      %107 = vector.broadcast %cst_68 : f32 to vector<2x32xf32>
      %108 = arith.addf %106, %107 : vector<2x32xf32>
      %cst_69 = arith.constant 5.000000e-01 : f32
      %109 = vector.broadcast %cst_69 : f32 to vector<2x32xf32>
      %110 = arith.mulf %109, %108 : vector<2x32xf32>
      %111 = vector.extract_strided_slice %102 {offsets = [0, 32], sizes = [2, 32], strides = [1, 1]} : vector<2x128xf32> to vector<2x32xf32>
      %cst_70 = arith.constant 5.000000e-01 : f32
      %112 = vector.broadcast %cst_70 : f32 to vector<2x32xf32>
      %113 = arith.mulf %112, %111 : vector<2x32xf32>
      %114 = math.tanh %113 : vector<2x32xf32>
      %cst_71 = arith.constant 1.000000e+00 : f32
      %115 = vector.broadcast %cst_71 : f32 to vector<2x32xf32>
      %116 = arith.addf %114, %115 : vector<2x32xf32>
      %cst_72 = arith.constant 5.000000e-01 : f32
      %117 = vector.broadcast %cst_72 : f32 to vector<2x32xf32>
      %118 = arith.mulf %117, %116 : vector<2x32xf32>
      %119 = vector.extract_strided_slice %102 {offsets = [0, 64], sizes = [2, 32], strides = [1, 1]} : vector<2x128xf32> to vector<2x32xf32>
      %120 = math.tanh %119 : vector<2x32xf32>
      %121 = vector.extract_strided_slice %102 {offsets = [0, 96], sizes = [2, 32], strides = [1, 1]} : vector<2x128xf32> to vector<2x32xf32>
      %cst_73 = arith.constant 5.000000e-01 : f32
      %122 = vector.broadcast %cst_73 : f32 to vector<2x32xf32>
      %123 = arith.mulf %122, %121 : vector<2x32xf32>
      %124 = math.tanh %123 : vector<2x32xf32>
      %cst_74 = arith.constant 1.000000e+00 : f32
      %125 = vector.broadcast %cst_74 : f32 to vector<2x32xf32>
      %126 = arith.addf %124, %125 : vector<2x32xf32>
      %cst_75 = arith.constant 5.000000e-01 : f32
      %127 = vector.broadcast %cst_75 : f32 to vector<2x32xf32>
      %128 = arith.mulf %127, %126 : vector<2x32xf32>
      %129 = arith.mulf %118, %arg29 : vector<2x32xf32>
      %130 = arith.mulf %110, %120 : vector<2x32xf32>
      %131 = arith.addf %129, %130 : vector<2x32xf32>
      %132 = math.tanh %131 : vector<2x32xf32>
      %133 = arith.mulf %128, %132 : vector<2x32xf32>
      %134 = arith.addi %21, %93 : i32
      %135 = vector.broadcast %134 : i32 to vector<2x1xi32>
      %136 = arith.cmpi slt, %135, %1 : vector<2x1xi32>
      %cst_76 = arith.constant 0.000000e+00 : f32
      %137 = vector.shape_cast %136 : vector<2x1xi1> to vector<2x1xi1>
      %138 = vector.broadcast %137 : vector<2x1xi1> to vector<2x32xi1>
      %139 = vector.broadcast %cst_76 : f32 to vector<2x32xf32>
      %140 = arith.select %138, %133, %139 : vector<2x32xi1>, vector<2x32xf32>
      %141 = arith.truncf %140 : vector<2x32xf32> to vector<2x32xbf16>
      %c0_77 = arith.constant 0 : index
      %142 = arith.index_cast %93 : i32 to index
      %c0_78 = arith.constant 0 : index
      %c0_79 = arith.constant 0 : index
      %143 = vector.load %arg16[%c0_77, %142, %c0_78, %c0_79] : memref<1x4x2x32xbf16, #tpu.memory_space<vmem>>, vector<1x1x2x32xbf16>
      %144 = vector.shape_cast %143 : vector<1x1x2x32xbf16> to vector<2x32xbf16>
      %145 = vector.shape_cast %141 : vector<2x32xbf16> to vector<1x1x2x32xbf16>
      tpu.vector_store %arg16[%c0_77, %142, %c0_78, %c0_79], %145 {strides = array<i32>} : memref<1x4x2x32xbf16, #tpu.memory_space<vmem>>, vector<1x1x2x32xbf16>,
      %146 = vector.shape_cast %136 : vector<2x1xi1> to vector<2x1xi1>
      %147 = vector.broadcast %146 : vector<2x1xi1> to vector<2x32xi1>
      %148 = arith.select %147, %133, %arg28 : vector<2x32xi1>, vector<2x32xf32>
      %149 = vector.shape_cast %136 : vector<2x1xi1> to vector<2x1xi1>
      %150 = vector.broadcast %149 : vector<2x1xi1> to vector<2x32xi1>
      %151 = arith.select %150, %131, %arg29 : vector<2x32xi1>, vector<2x32xf32>
      scf.yield %89, %92, %148, %151 : vector<2x32xf32>, vector<2x32xf32>, vector<2x32xf32>, vector<2x32xf32>
    }
    %c4_i32_38 = arith.constant 4 : i32
    %c0_39 = arith.constant 0 : index
    %c0_40 = arith.constant 0 : index
    %28 = vector.load %arg21[%c0_39, %c0_40] : memref<2x32xf32, #tpu.memory_space<vmem>>, vector<2x32xf32>
    tpu.vector_store %arg21[%c0_39, %c0_40], %27#0 {strides = array<i32>} : memref<2x32xf32, #tpu.memory_space<vmem>>, vector<2x32xf32>,
    %c0_41 = arith.constant 0 : index
    %c0_42 = arith.constant 0 : index
    %29 = vector.load %arg22[%c0_41, %c0_42] : memref<2x32xf32, #tpu.memory_space<vmem>>, vector<2x32xf32>
    tpu.vector_store %arg22[%c0_41, %c0_42], %27#1 {strides = array<i32>} : memref<2x32xf32, #tpu.memory_space<vmem>>, vector<2x32xf32>,
    %c0_43 = arith.constant 0 : index
    %c0_44 = arith.constant 0 : index
    %30 = vector.load %arg23[%c0_43, %c0_44] : memref<2x32xf32, #tpu.memory_space<vmem>>, vector<2x32xf32>
    tpu.vector_store %arg23[%c0_43, %c0_44], %27#2 {strides = array<i32>} : memref<2x32xf32, #tpu.memory_space<vmem>>, vector<2x32xf32>,
    %c0_45 = arith.constant 0 : index
    %c0_46 = arith.constant 0 : index
    %31 = vector.load %arg24[%c0_45, %c0_46] : memref<2x32xf32, #tpu.memory_space<vmem>>, vector<2x32xf32>
    tpu.vector_store %arg24[%c0_45, %c0_46], %27#3 {strides = array<i32>} : memref<2x32xf32, #tpu.memory_space<vmem>>, vector<2x32xf32>,
    %c1_i32_47 = arith.constant 1 : i32
    %32 = arith.cmpi eq, %arg1, %c1_i32_47 : i32
    %33 = arith.extui %32 : i1 to i32
    %c0_i32_48 = arith.constant 0 : i32
    %34 = arith.cmpi ne, %33, %c0_i32_48 : i32
    scf.if %34 {
      %c0_49 = arith.constant 0 : index
      %c0_50 = arith.constant 0 : index
      %35 = vector.load %arg11[%c0_49, %c0_50] : memref<64x32xf32, #tpu.memory_space<vmem>>, vector<32x32xf32>
      %cst_51 = arith.constant dense<0.000000e+00> : vector<2x32xf32>
      %36 = tpu.matmul %27#0, %35, %cst_51 {dimension_numbers = #tpu.dot_dimension_numbers<[1], [0], [0], [1], [0, 0, 1, 1], [], []>} : vector<2x32xf32>, vector<32x32xf32>, vector<2x32xf32> -> vector<2x32xf32>
      %c32 = arith.constant 32 : index
      %c0_52 = arith.constant 0 : index
      %37 = vector.load %arg11[%c32, %c0_52] : memref<64x32xf32, #tpu.memory_space<vmem>>, vector<32x32xf32>
      %cst_53 = arith.constant dense<0.000000e+00> : vector<2x32xf32>
      %38 = tpu.matmul %27#2, %37, %cst_53 {dimension_numbers = #tpu.dot_dimension_numbers<[1], [0], [0], [1], [0, 0, 1, 1], [], []>} : vector<2x32xf32>, vector<32x32xf32>, vector<2x32xf32> -> vector<2x32xf32>
      %39 = arith.addf %36, %38 : vector<2x32xf32>
      %c0_54 = arith.constant 0 : index
      %c0_55 = arith.constant 0 : index
      %40 = vector.load %arg12[%c0_54, %c0_55] : memref<1x32xf32, #tpu.memory_space<vmem>>, vector<1x32xf32>
      %41 = vector.broadcast %40 : vector<1x32xf32> to vector<2x32xf32>
      %42 = arith.addf %39, %41 : vector<2x32xf32>
      %c0_56 = arith.constant 0 : index
      %c0_57 = arith.constant 0 : index
      %c0_58 = arith.constant 0 : index
      %43 = vector.load %arg17[%c0_56, %c0_57, %c0_58] : memref<1x2x32xf32, #tpu.memory_space<vmem>>, vector<1x2x32xf32>
      %44 = vector.shape_cast %43 : vector<1x2x32xf32> to vector<2x32xf32>
      %45 = vector.shape_cast %42 : vector<2x32xf32> to vector<1x2x32xf32>
      tpu.vector_store %arg17[%c0_56, %c0_57, %c0_58], %45 {strides = array<i32>} : memref<1x2x32xf32, #tpu.memory_space<vmem>>, vector<1x2x32xf32>,
      %c0_59 = arith.constant 0 : index
      %c0_60 = arith.constant 0 : index
      %46 = vector.load %arg13[%c0_59, %c0_60] : memref<64x32xf32, #tpu.memory_space<vmem>>, vector<32x32xf32>
      %cst_61 = arith.constant dense<0.000000e+00> : vector<2x32xf32>
      %47 = tpu.matmul %27#1, %46, %cst_61 {dimension_numbers = #tpu.dot_dimension_numbers<[1], [0], [0], [1], [0, 0, 1, 1], [], []>} : vector<2x32xf32>, vector<32x32xf32>, vector<2x32xf32> -> vector<2x32xf32>
      %c32_62 = arith.constant 32 : index
      %c0_63 = arith.constant 0 : index
      %48 = vector.load %arg13[%c32_62, %c0_63] : memref<64x32xf32, #tpu.memory_space<vmem>>, vector<32x32xf32>
      %cst_64 = arith.constant dense<0.000000e+00> : vector<2x32xf32>
      %49 = tpu.matmul %27#3, %48, %cst_64 {dimension_numbers = #tpu.dot_dimension_numbers<[1], [0], [0], [1], [0, 0, 1, 1], [], []>} : vector<2x32xf32>, vector<32x32xf32>, vector<2x32xf32> -> vector<2x32xf32>
      %50 = arith.addf %47, %49 : vector<2x32xf32>
      %c0_65 = arith.constant 0 : index
      %c0_66 = arith.constant 0 : index
      %51 = vector.load %arg14[%c0_65, %c0_66] : memref<1x32xf32, #tpu.memory_space<vmem>>, vector<1x32xf32>
      %52 = vector.broadcast %51 : vector<1x32xf32> to vector<2x32xf32>
      %53 = arith.addf %50, %52 : vector<2x32xf32>
      %c0_67 = arith.constant 0 : index
      %c0_68 = arith.constant 0 : index
      %c0_69 = arith.constant 0 : index
      %54 = vector.load %arg18[%c0_67, %c0_68, %c0_69] : memref<1x2x32xf32, #tpu.memory_space<vmem>>, vector<1x2x32xf32>
      %55 = vector.shape_cast %54 : vector<1x2x32xf32> to vector<2x32xf32>
      %56 = vector.shape_cast %53 : vector<2x32xf32> to vector<1x2x32xf32>
      tpu.vector_store %arg18[%c0_67, %c0_68, %c0_69], %56 {strides = array<i32>} : memref<1x2x32xf32, #tpu.memory_space<vmem>>, vector<1x2x32xf32>,
    } else {
    }
    return
  }
  func.func @transform_0(%arg0: i32, %arg1: i32) -> (i32, i32, i32) {
    %c0_i32 = arith.constant 0 : i32
    %c0_i32_0 = arith.constant 0 : i32
    %c0_i32_1 = arith.constant 0 : i32
    return %arg0, %c0_i32, %c0_i32_0 : i32, i32, i32
  }
  func.func @transform_1(%arg0: i32, %arg1: i32) -> (i32, i32, i32) {
    %c0_i32 = arith.constant 0 : i32
    %c0_i32_0 = arith.constant 0 : i32
    return %arg0, %arg1, %c0_i32 : i32, i32, i32
  }
  func.func @transform_2(%arg0: i32, %arg1: i32) -> (i32, i32, i32) {
    %c1_i32 = arith.constant 1 : i32
    %0 = arith.subi %c1_i32, %arg1 : i32
    %c0_i32 = arith.constant 0 : i32
    %c0_i32_0 = arith.constant 0 : i32
    return %arg0, %0, %c0_i32 : i32, i32, i32
  }
  func.func @transform_3(%arg0: i32, %arg1: i32) -> (i32, i32) {
    %c0_i32 = arith.constant 0 : i32
    %c0_i32_0 = arith.constant 0 : i32
    %c0_i32_1 = arith.constant 0 : i32
    return %c0_i32, %c0_i32_0 : i32, i32
  }
  func.func @transform_4(%arg0: i32, %arg1: i32) -> (i32, i32) {
    %c0_i32 = arith.constant 0 : i32
    %c0_i32_0 = arith.constant 0 : i32
    %c0_i32_1 = arith.constant 0 : i32
    return %c0_i32, %c0_i32_0 : i32, i32
  }
  func.func @transform_5(%arg0: i32, %arg1: i32) -> (i32, i32) {
    %c0_i32 = arith.constant 0 : i32
    %c0_i32_0 = arith.constant 0 : i32
    %c0_i32_1 = arith.constant 0 : i32
    return %c0_i32, %c0_i32_0 : i32, i32
  }
  func.func @transform_6(%arg0: i32, %arg1: i32) -> (i32, i32) {
    %c0_i32 = arith.constant 0 : i32
    %c0_i32_0 = arith.constant 0 : i32
    %c0_i32_1 = arith.constant 0 : i32
    return %c0_i32, %c0_i32_0 : i32, i32
  }
  func.func @transform_7(%arg0: i32, %arg1: i32) -> (i32, i32) {
    %c0_i32 = arith.constant 0 : i32
    %c0_i32_0 = arith.constant 0 : i32
    %c0_i32_1 = arith.constant 0 : i32
    return %c0_i32, %c0_i32_0 : i32, i32
  }
  func.func @transform_8(%arg0: i32, %arg1: i32) -> (i32, i32) {
    %c0_i32 = arith.constant 0 : i32
    %c0_i32_0 = arith.constant 0 : i32
    %c0_i32_1 = arith.constant 0 : i32
    return %c0_i32, %c0_i32_0 : i32, i32
  }
  func.func @transform_9(%arg0: i32, %arg1: i32) -> (i32, i32) {
    %c0_i32 = arith.constant 0 : i32
    %c0_i32_0 = arith.constant 0 : i32
    %c0_i32_1 = arith.constant 0 : i32
    return %c0_i32, %c0_i32_0 : i32, i32
  }
  func.func @transform_10(%arg0: i32, %arg1: i32) -> (i32, i32) {
    %c0_i32 = arith.constant 0 : i32
    %c0_i32_0 = arith.constant 0 : i32
    %c0_i32_1 = arith.constant 0 : i32
    return %c0_i32, %c0_i32_0 : i32, i32
  }
  func.func @transform_11(%arg0: i32, %arg1: i32) -> (i32, i32) {
    %c0_i32 = arith.constant 0 : i32
    %c0_i32_0 = arith.constant 0 : i32
    %c0_i32_1 = arith.constant 0 : i32
    return %c0_i32, %c0_i32_0 : i32, i32
  }
  func.func @transform_12(%arg0: i32, %arg1: i32) -> (i32, i32) {
    %c0_i32 = arith.constant 0 : i32
    %c0_i32_0 = arith.constant 0 : i32
    %c0_i32_1 = arith.constant 0 : i32
    return %c0_i32, %c0_i32_0 : i32, i32
  }
  func.func @transform_13(%arg0: i32, %arg1: i32) -> (i32, i32, i32, i32) {
    %c0_i32 = arith.constant 0 : i32
    %c0_i32_0 = arith.constant 0 : i32
    %c0_i32_1 = arith.constant 0 : i32
    return %arg0, %arg1, %c0_i32, %c0_i32_0 : i32, i32, i32, i32
  }
  func.func @transform_14(%arg0: i32, %arg1: i32) -> (i32, i32, i32, i32) {
    %c1_i32 = arith.constant 1 : i32
    %0 = arith.subi %c1_i32, %arg1 : i32
    %c0_i32 = arith.constant 0 : i32
    %c0_i32_0 = arith.constant 0 : i32
    %c0_i32_1 = arith.constant 0 : i32
    return %arg0, %0, %c0_i32, %c0_i32_0 : i32, i32, i32, i32
  }
  func.func @transform_15(%arg0: i32, %arg1: i32) -> (i32, i32, i32) {
    %c0_i32 = arith.constant 0 : i32
    %c0_i32_0 = arith.constant 0 : i32
    %c0_i32_1 = arith.constant 0 : i32
    return %arg0, %c0_i32, %c0_i32_0 : i32, i32, i32
  }
  func.func @transform_16(%arg0: i32, %arg1: i32) -> (i32, i32, i32) {
    %c0_i32 = arith.constant 0 : i32
    %c0_i32_0 = arith.constant 0 : i32
    %c0_i32_1 = arith.constant 0 : i32
    return %arg0, %c0_i32, %c0_i32_0 : i32, i32, i32
  }
}

</mosaic_0001>

<bundles_post_ra>
// kernel: tpu_custom_call.1
= control target key start
LH: loop header
LB: loop body
LE: loop exit
PB: predicated region body
PF: predicated region fallthrough
CT: control target
= control target key end

     0   :  { %s2785_s0 = inlined_call_operand.vmem [shape: s32[1,2,1], index: 0, kind: input, shape index: {}]   ;;  %s2786_s1 = inlined_call_operand.vmem [shape: bf16[1,16,16], index: 1, kind: input, shape index: {}]   ;;  %s2787_s2 = inlined_call_operand.vmem [shape: bf16[1,16,16], index: 2, kind: input, shape index: {}]   ;;  %s2788_s3 = inlined_call_operand.vmem [shape: bf16[16,128], index: 3, kind: input, shape index: {}]   ;;  %s2789_s4 = inlined_call_operand.vmem [shape: bf16[16,128], index: 4, kind: input, shape index: {}]   ;;  %s2790_s5 = inlined_call_operand.vmem [shape: f32[1,128], index: 5, kind: input, shape index: {}]   ;;  %s2791_s6 = inlined_call_operand.vmem [shape: f32[1,128], index: 6, kind: input, shape index: {}]   ;;  %s2792_s7 = inlined_call_operand.vmem [shape: bf16[32,128], index: 7, kind: input, shape index: {}]   ;;  %s2793_s8 = inlined_call_operand.vmem [shape: bf16[32,128], index: 8, kind: input, shape index: {}]   ;;  %s2794_s9 = inlined_call_operand.vmem [shape: f32[64,32], index: 9, kind: input, shape index: {}]   ;;  %s2795_s10 = inlined_call_operand.vmem [shape: f32[1,32], index: 10, kind: input, shape index: {}]   ;;  %s2796_s11 = inlined_call_operand.vmem [shape: f32[64,32], index: 11, kind: input, shape index: {}]   ;;  %s2797_s12 = inlined_call_operand.vmem [shape: f32[1,32], index: 12, kind: input, shape index: {}]   ;;  %s2798_s13 = inlined_call_operand.hbm [shape: bf16[1,8,2,32], index: 13, kind: output, shape index: {0}]   ;;  %s2799_s14 = inlined_call_operand.hbm [shape: bf16[1,8,2,32], index: 14, kind: output, shape index: {1}]   ;;  %s2800_s15 = inlined_call_operand.hbm [shape: f32[1,2,32], index: 15, kind: output, shape index: {2}]   ;;  %s2801_s16 = inlined_call_operand.hbm [shape: f32[1,2,32], index: 16, kind: output, shape index: {3}]  }
   0x1   :  { %2815 = sst [smem:[#allocation27_spill]] %s2785_s0 }
   0x2   :  { %2816 = sst [smem:[#allocation28_spill]] %s2786_s1 }
   0x3   :  { %2817 = sst [smem:[#allocation29_spill]] %s2787_s2 }
   0x4   :  { %2818 = sst [smem:[#allocation30_spill]] %s2788_s3 }
   0x5   :  { %2819 = sst [smem:[#allocation31_spill]] %s2789_s4 }
   0x6   :  { %2820 = sst [smem:[#allocation32_spill]] %s2790_s5 }
   0x7   :  { %2821 = sst [smem:[#allocation33_spill]] %s2791_s6 }
   0x8   :  { %2822 = sst [smem:[#allocation34_spill]] %s2792_s7 }
   0x9   :  { %2823 = sst [smem:[#allocation35_spill]] %s2797_s12 }
   0xa   :  { %2824 = sst [smem:[#allocation36_spill]] %s2798_s13 }
   0xb   :  { %2825 = sst [smem:[#allocation37_spill]] %s2799_s14 }
   0xc   :  { %2826 = sst [smem:[#allocation38_spill]] %s2800_s15 }
   0xd   :  { %2827 = sst [smem:[#allocation39_spill]] %s2801_s16 }
   0xe   :  { %22 = vsyncpa [#allocation9], 0 }
   0xf   :  { %24 = vsyncpa [#allocation9 + $0x1], 0 }
  0x10   :  { %25 = vsyncpa [#allocation11], 0 }
  0x11   :  { %27 = vsyncpa [#allocation11 + $0x1], 0 }
  0x12   :  { %28 = vsyncpa [#allocation14], 0  ;;  %s2291_s21 = smov 0   ;;  %s2293_s22 = smov 0  }
  0x13   :  { %s2295_s23 = smov 0   ;;  %s2297_s24 = smov 0  }
  0x14   :  { %s2299_s25 = smov 0   ;;  %s2301_s26 = smov 0  }
  0x15   :  { %s2303_s27 = smov 0   ;;  %s2305_s28 = smov 0  }
  0x16   :  { %s2307_s29 = smov 0  }
  0x17 LB: > { %2828 = sst [smem:[#allocation19_spill]] %s2142_s23  ;;  %s2802_s30 = sadd.s32 4294967295, %s2166_s29   ;;  %s2166_s29 = sphi %s2307_s29, %s34_s29   ;;  %s2162_s28 = sphi %s2305_s28, %s2877_s28   ;;  %s2158_s27 = sphi %s2303_s27, %s2876_s27   ;;  %s2154_s26 = sphi %s2301_s26, %s2875_s26   ;;  %s2150_s25 = sphi %s2299_s25, %s2881_s25   ;;  %s2146_s24 = sphi %s2297_s24, %s2880_s24   ;;  %s2142_s23 = sphi %s2295_s23, %s2873_s23   ;;  %s2138_s22 = sphi %s2293_s22, %s2879_s22   ;;  %s2134_s21 = sphi %s2291_s21, %s2878_s21  }
  0x18   : > { %2829 = sst [smem:[#allocation20_spill]] %s2146_s24  ;;  %s2808_s0 = sadd.s32 4294967294, %s2166_s29  }
  0x19   : > { %2830 = sst [smem:[#allocation21_spill]] %s2154_s26  ;;  %s43_s17 = sadd.s32 1, %s2162_s28 }
  0x1a   : > { %2831 = sst [smem:[#allocation22_spill]] %s2162_s28  ;;  %s349_s18 = sadd.s32 1, %s2154_s26 }
  0x1b   : > { %p44_p0 = scmp.ge.s32.totalorder %s43_s17, 2  ;;  %p359_p1 = scmp.ne.s32.totalorder %s2154_s26, %s2150_s25 }
  0x1c   : > { %p2344_p2 = scmp.eq.s32.totalorder %s2802_s30, 1  ;;  %p365_p3 = scmp.ne.s32.totalorder %s2150_s25, %s2146_s24 }
  0x1d   : > { %s2883_s17 = smov (%p44_p0, %s43_s17), 0  ;;  %p2360_p5 = scmp.eq.s32.totalorder %s2808_s0, 1 }
  0x1e   : > { %2833 = sst [smem:[#allocation23_spill]] %s2883_s17  ;;  %p2354_p4 = por %p2344_p2, %p359_p1 }
  0x1f   : > { %s345_s24 = ssub.s32 %s2162_s28, %s2883_s17  ;;  %s372_s16 = ssub.s32 1, %s2162_s28 }
  0x20   : > { %s2834_s20 = scalar_select %p2354_p4, 1, 0 }
  0x21   : > { %p347_p6 = scmp.eq.s32.totalorder %s345_s24, 0  ;;  %p2369_p7 = por %p2360_p5, %p365_p3 }
  0x22   : > { %2835 = sst [smem:[#allocation24_spill]] %s2834_s20  ;;  %s373_s13 = ssub.s32 1, %s2883_s17 }
  0x23   : > { %s379_s14 = sadd.s32 1, %s2142_s23  ;;  %s375_s20 = ssub.s32 %s372_s16, %s373_s13 }
  0x24   : > { %s2376_s12 = scalar_select %p347_p6, %s2154_s26, %s349_s18  }
  0x25   : > { %p389_p8 = scmp.ne.s32.totalorder %s2142_s23, %s2138_s22  ;;  %p377_p9 = scmp.eq.s32.totalorder %s375_s20, 0 }
  0x26   : > { %2838 = sst [smem:[#allocation25_spill]] %s2376_s12  ;;  %p395_p10 = scmp.ne.s32.totalorder %s2138_s22, %s2134_s21 }
  0x27   : > { %p2384_p11 = por %p389_p8, %p2344_p2  ;;  %p1647_p12 = scmp.ge.s32.totalorder %s2166_s29, 1 }
  0x28   : > { %s2390_s24 = scalar_select %p377_p9, %s2142_s23, %s379_s14  }
  0x29   : > { %p2394_p13 = por %p395_p10, %p2360_p5  ;;  %p527_p0 = scmp.lt.s32.totalorder %s2166_s29, 3 }
  0x2a   : > { %2840 = sst [smem:[#allocation26_spill]] %s2390_s24 }
  0x2b   : > { %s2841_s28 = scalar_select %p2394_p13, 1, 0 }
  0x2c   : > { %p528_p1 = pnand %p1647_p12, %p527_p0 }
  0x2d   : > { %s2813_s13 = sand.u32 (!%p528_p1), 1, %s2150_s25   ;;  %s591_s16 = sand.u32 (!%p528_p1), 1, %s2138_s22  }
  0x2e   : > { %531 = sbr.rel (%p528_p1) target bundleno = 1295 (0x50f), region = 72  ;;  %s2842_s20 = sld [smem:[#allocation27_spill]] (!%p528_p1) }
  0x2f   : > { %s2843_s7 = sld [smem:[#allocation34_spill]] (!%p528_p1)  ;;  %s2413_s30 = sshll.u32 (!%p528_p1), %s2813_s13, 2 }
  0x30   : > { %s2415_s12 = sshll.u32 (!%p528_p1), %s591_s16, 2  ;;  %s2844_s5 = sld [smem:[#allocation32_spill]] (!%p528_p1) }
  0x31   : > { %s2845_s6 = sld [smem:[#allocation33_spill]] (!%p528_p1)  ;;  %p604_p3 = scmp.lt.s32.totalorder (!%p528_p1), %s2158_s27, 1 }
  0x32   : > { %s2846_s3 = sld [smem:[#allocation30_spill]] (!%p528_p1)  ;;  %s2470_s18 = ssub.s32 (!%p528_p1), 1, %s2158_s27 }
  0x33   : > { %v2435_v5 = vld [vmem:[%s2793_s8] sm:$0xf]  ;;  %v2440_v6 = vld [vmem:[%s2793_s8 + $0x4] sm:$0xf]  ;;  %v2445_v7 = vld [vmem:[%s2793_s8 + $0x8] sm:$0xf] }
  0x34   : > { %v2404_v0 = vld [vmem:[%s2842_s20] sm:$0x3]  ;;  %v2450_v8 = vld [vmem:[%s2793_s8 + $0xc] sm:$0xf]  ;;  %v2188_v12 = vmov 0.0   ;;  %s2847_s4 = sld [smem:[#allocation31_spill]] }
  0x35   : > { %v2409_v1 = vld [vmem:[%s2843_s7] sm:$0xf]  ;;  %v2420_v2 = vld [vmem:[%s2843_s7 + $0x4] sm:$0xf]  ;;  %v2425_v3 = vld [vmem:[%s2843_s7 + $0x8] sm:$0xf]  ;;  %1720 = vmatprep.subr.bf16.mxu0 %v2188_v12  ;;  %1726 = vmatprep.subr.bf16.mxu1 %v2188_v12 }
  0x36   : > { %v2430_v4 = vld [vmem:[%s2843_s7 + $0xc] sm:$0xf]  ;;  %v2455_v9 = vld [vmem:[%s2844_s5] ss:$0 sm:$0xff]  ;;  %vm2189_vm0 = vmmov 0   ;;  %s605_s17 = scalar_select %p604_p3, %s2158_s27, 1 }
  0x37   : > { %v2460_v10 = vld [vmem:[%s2845_s6] ss:$0 sm:$0xff]  ;;  %1722 = vmatprep.mubr.msk.bf16.mxu0 %vm2189_vm0, %v2188_v12  ;;  %1728 = vmatprep.mubr.msk.bf16.mxu1 %vm2189_vm0, %v2188_v12  ;;  %p613_p5 = scmp.lt.s32.totalorder %s2470_s18, 1  ;;  %vm644_vm1 = vcmask 130048   ;;  %s2848_s1 = sld [smem:[#allocation28_spill]] }
  0x38   : > { %v1944_v11 = vld [vmem:[%s2846_s3] sm:$0xff]   ;;  %s1650_s20 = sshll.u32 %s605_s17, 2  ;;  %s2849_s2 = sld [smem:[#allocation29_spill]] }
  0x39   : > { %1721 = vmatpush3.bf16.msra.mxu0 %v1944_v11  ;;  %s614_s24 = scalar_select %p613_p5, %s2470_s18, 1 }
  0x3a   : > { %v1945_v13 = vld [vmem:[%s2847_s4] sm:$0xff]   ;;  %s2814_s17 = scalar_lea.vmem [#allocation8], %s2413_s30  ;;  %p1656_p6 = scmp.ne.s32.totalorder %s2158_s27, 0 }
  0x3b   : > { %1727 = vmatpush3.bf16.msra.mxu1 %v1945_v13  ;;  %s1651_s23 = sshll.u32 %s614_s24, 2 }
  0x3d   : > { %s609_s26 = scalar_lea.vmem %s2848_s1, %s1650_s20 }
  0x3e   : > { %v635_v14 = vld [vmem:[%s609_s26] sm:$0xf]  ;;  %s618_s3 = scalar_lea.vmem %s2849_s2, %s1651_s23 }
  0x3f   : > { %1723 = vmatmul.mubr.msk.bf16.vlgmr.msra.gmra.mxu0 %vm644_vm1, %v635_v14  ;;  %v689_v15 = vld [vmem:[%s618_s3] sm:$0xf] }
  0x40   : > { %1729 = vmatmul.mubr.msk.bf16.vlgmr.msra.gmra.mxu1 %vm644_vm1, %v689_v15 }
  0xff   : > { %v682_v16 = vpop.f32.mrf.mxu0 }
 0x100   : > { %688 = vst [vmem:[#allocation2] sm:$0xff] %v682_v16  ;;  %v735_v18 = vpop.f32.mrf.mxu1 }
 0x101   : > { %v1724_v17 = vpop.f32.mrf.mxu0  ;;  %741 = vst [vmem:[#allocation3] sm:$0xff] %v735_v18 }
 0x102   : > { %v1730_v20 = vpop.f32.mrf.mxu1  ;;  %745 = sbr.rel (%p1656_p6) target bundleno = 266 (0x10a), region = 76 }
 0x103   : > { %v685_v19 = vpop.f32.mrf.mxu0 }
 0x104   : > { %v738_v22 = vpop.f32.mrf.mxu1 }
 0x105   : > { %v1725_v21 = vpop.f32.mrf.mxu0 }
 0x106   : > { %v1731_v23 = vpop.f32.mrf.mxu1 }
 0x107   : > { %vm746_vm2 = vcmask 254976   ;;  %v2190_v24 = vmov 0.0  }
 0x108   : > { %747 = vst.msk [vmem:[#allocation4] sm:$0x3] %vm746_vm2, %v2190_v24  ;;  %748 = vst.msk [vmem:[#allocation5] sm:$0x3] %vm746_vm2, %v2190_v24 }
 0x109   : > { %749 = vst.msk [vmem:[#allocation6] sm:$0x3] %vm746_vm2, %v2190_v24  ;;  %750 = vst.msk [vmem:[#allocation7] sm:$0x3] %vm746_vm2, %v2190_v24 }
 0x10a PF: > { %s1657_s3 = sshll.u32 %s2158_s27, 2  ;;  %s1658_s13 = sshll.u32 %s2470_s18, 2 }
 0x10b   : > { %s2494_s14 = smov 0  }
 0x10f   : > { %v754_v25 = vld [vmem:[#allocation4] sm:$0x3]   ;;  %v755_v26 = vld [vmem:[#allocation5] sm:$0x3]  }
 0x110   : > { %v756_v27 = vld [vmem:[#allocation6] sm:$0x3]   ;;  %v757_v28 = vld [vmem:[#allocation7] sm:$0x3]  }
 0x111 LB: >> { %v1662_v29 = vcombine.low %v2425_v3, %v2430_v4  ;;  %v1667_v30 = vcombine.low %v2445_v7, %v2450_v8  ;;  %v2191_v31 = vmov 0.0   ;;  %v1661_v32 = vcombine.low %v2409_v1, %v2420_v2  ;;  %s2193_s16 = smov 32   ;;  %s2524_s26 = ssub.s32 3, %s2186_s14  ;;  %s2186_s14 = sphi %s2494_s14, %s763_s14   ;;  %v2182_v25 = vphi %v754_v25, %v2856_v25   ;;  %v2178_v26 = vphi %v755_v26, %v2855_v26   ;;  %v2174_v27 = vphi %v756_v27, %v2854_v27   ;;  %v2170_v28 = vphi %v757_v28, %v2853_v28  }
 0x112   : >> { %1732 = vmatprep.subr.bf16.mxu0 %v2191_v31  ;;  %1740 = vmatprep.subr.bf16.mxu1 %v2191_v31  ;;  %v1666_v33 = vcombine.low %v2435_v5, %v2440_v6  ;;  %vm2192_vm3 = vmmov 0   ;;  %v778_v34 = vpack.c.bf16 %v2182_v25, %v2182_v25  ;;  %v910_v35 = vpack.c.bf16 %v2174_v27, %v2174_v27  ;;  %s1659_s24 = sshll.u32 %s2186_s14, 1  ;;  %s1664_s23 = sshll.u32 %s2524_s26, 1 }
 0x113   : >> { %1733 = vmatpush3.bf16.msra.mxu0 %v1662_v29  ;;  %1741 = vmatpush3.bf16.msra.mxu1 %v1667_v30  ;;  %vm791_vm4 = vcmask 261120   ;;  %s769_s21 = scalar_lea.vmem [#allocation2], %s1659_s24  ;;  %s901_s20 = scalar_lea.vmem [#allocation3], %s1664_s23  ;;  %v2194_v50 = vmov 0   ;;  %v2197_v30 = vmov 1966171168  }
 0x114   : >> { %1734 = vmatprep.subr.bf16.mxu0 %v2191_v31  ;;  %1742 = vmatprep.subr.bf16.mxu1 %v2191_v31  ;;  %v770_v36 = vld [vmem:[%s769_s21] sm:$0x3]  ;;  %s862_s24 = sadd.s32 %s2186_s14, %s1657_s3  ;;  %s993_s23 = sadd.s32 %s1658_s13, %s2524_s26  ;;  %vm891_vm9 = vcmask 253952  }
 0x115   : >> { %1736 = vmatprep.mubr.msk.bf16.mxu0 %vm2192_vm3, %v2191_v31  ;;  %1744 = vmatprep.mubr.msk.bf16.mxu1 %vm2192_vm3, %v2191_v31  ;;  %v902_v37 = vld [vmem:[%s901_s20] sm:$0x3]  ;;  %v777_v38 = vadd.f32 %v2455_v9, %v770_v36  ;;  %s2195_s20 = smov 64   ;;  %v863_v58 = vstv %s862_s24  ;;  %v994_v63 = vstv %s993_s23  ;;  %s2196_s21 = smov 96   ;;  %v874_v31 = vunpack.c.l.s4 %v2197_v30 }
 0x116   : >> { %842 = vrot.lane.b32.xlu1 %v2178_v26, %s2193_s16  ;;  %v909_v39 = vadd.f32 %v2460_v10, %v902_v37  ;;  %1946 = vset.pattern.permute.xlu0 %v2194_v50  ;;  %vm864_vm5 = vcmp.lt.s32.totalorder %v863_v58, %v2404_v0  ;;  %vm995_vm6 = vcmp.lt.s32.totalorder %v994_v63, %v2404_v0  ;;  %s2851_s24 = scalar_lea.vmem [#allocation10], %s2415_s12 }
 0x117   : >> { %1735 = vmatpush3.bf16.msra.mxu0 %v1661_v32  ;;  %1743 = vmatpush3.bf16.msra.mxu1 %v1666_v33  ;;  %v865_v13 = vsel %vm864_vm5, 1, %v2194_v50  ;;  %v996_v15 = vsel %vm995_vm6, 1, %v2194_v50  ;;  %v876_v32 = vlaneseq  ;;  %s1021_s23 = scalar_lea.vmem %s2851_s24, %s2524_s26 [#allocation10] }
 0x118   : >> { %1947 = vset.pattern.permute.xlu1 %v2194_v50 }
 0x11a   : >> { %1737 = vmatmul.mubr.msk.bf16.vlgmr.msra.gmra.mxu0 %vm791_vm4, %v778_v34  ;;  %1745 = vmatmul.mubr.msk.bf16.vlgmr.msra.gmra.mxu1 %vm791_vm4, %v910_v35  ;;  %v875_v34 = vunpack.c.0.s8 %v874_v31  ;;  %v877_v35 = vshrl.u32 %v876_v32, 7 }
 0x11b   : >> { %973 = vrot.lane.b32.xlu1 %v2170_v28, %s2193_s16 }
 0x188   : >> { %v843_v16 = vpop.permute.xlu1 %842 }
 0x18d   : >> { %v974_v18 = vpop.permute.xlu1 %973 }
 0x1da   : >> { %v829_v40 = vpop.f32.mrf.mxu0  ;;  %v960_v41 = vpop.f32.mrf.mxu1 }
 0x1db   : >> { %v835_v42 = vadd.f32 %v829_v40, %v777_v38  ;;  %v966_v43 = vadd.f32 %v960_v41, %v909_v39 }
 0x1dc   : >> { %v1738_v44 = vpop.f32.mrf.mxu0  ;;  %v1746_v45 = vpop.f32.mrf.mxu1 }
 0x1dd   : >> { %1948 = vtanh.f32 %v835_v42  ;;  %v836_v53 = vmul.f32 0.5, %v835_v42  ;;  %v967_v54 = vmul.f32 0.5, %v966_v43 }
 0x1de   : >> { %v832_v46 = vpop.f32.mrf.mxu0  ;;  %v963_v47 = vpop.f32.mrf.mxu1  ;;  %1950 = vtanh.f32 %v966_v43 }
 0x1df   : >> { %1952 = vtanh.f32 %v836_v53 }
 0x1e0   : >> { %v1739_v48 = vpop.f32.mrf.mxu0  ;;  %v1747_v49 = vpop.f32.mrf.mxu1  ;;  %1954 = vtanh.f32 %v967_v54 }
 0x1ea   : >> { %v1949_v51 = vpop.eup %1948 }
 0x1eb   : >> { %847 = vrot.lane.b32.xlu0 %v1949_v51, %s2195_s20  ;;  %v1951_v52 = vpop.eup %1950 }
 0x1ec   : >> { %v1953_v55 = vpop.eup %1952 }
 0x1ed   : >> { %v838_v56 = vadd.f32 1.0, %v1953_v55  ;;  %v1955_v57 = vpop.eup %1954 }
 0x1ee   : >> { %v969_v59 = vadd.f32 1.0, %v1955_v57 }
 0x1ef   : >> { %978 = vrot.lane.b32.xlu0 %v1951_v52, %s2195_s20  ;;  %v839_v60 = vmul.f32 0.5, %v838_v56 }
 0x1f0   : >> { %v970_v11 = vmul.f32 0.5, %v969_v59 }
 0x1f1   : >> { %v845_v17 = vmul.f32 %v843_v16, %v839_v60 }
 0x1f2   : >> { %v976_v21 = vmul.f32 %v974_v18, %v970_v11 }
 0x25d   : >> { %v848_v61 = vpop.permute.xlu0 %847 }
 0x25e   : >> { %v850_v62 = vmul.f32 %v848_v61, %v839_v60 }
 0x260   : >> { %852 = vrot.lane.b32.xlu0 %v850_v62, %s2193_s16 }
 0x261   : >> { %v979_v12 = vpop.permute.xlu0 %978 }
 0x262   : >> { %v981_v14 = vmul.f32 %v979_v12, %v970_v11 }
 0x264   : >> { %867 = vperm.xlu0 %1946, %v865_v13   ;;  %983 = vrot.lane.b32.xlu1 %v981_v14, %s2193_s16 }
 0x268   : >> { %998 = vperm.xlu1 %1947, %v996_v15  }
 0x2d2   : >> { %v853_v19 = vpop.permute.xlu0 %852 }
 0x2d3   : >> { %v855_v20 = vadd.f32 %v853_v19, %v845_v17 }
 0x2d5   : >> { %1956 = vtanh.f32 %v855_v20 }
 0x2d6   : >> { %v984_v22 = vpop.permute.xlu1 %983 }
 0x2d7   : >> { %v986_v23 = vadd.f32 %v984_v22, %v976_v21 }
 0x2d9   : >> { %1958 = vtanh.f32 %v986_v23 }
 0x2df   : >> { %v868_v28 = vpop.permute.xlu0 %867 }
 0x2e0   : >> { %vm869_vm7 = vcmp.eq.s32.totalorder %v868_v28, 1 }
 0x2e1   : >> { %v898_v29 = vsel %vm869_vm7, %v855_v20, %v843_v16 }
 0x2e2   : >> { %v1957_v24 = vpop.eup %1956 }
 0x2e3   : >> { %858 = vrot.lane.b32.xlu1 %v1957_v24, %s2195_s20  ;;  %v999_v33 = vpop.permute.xlu1 %998 }
 0x2e4   : >> { %vm1000_vm8 = vcmp.eq.s32.totalorder %v999_v33, 1 }
 0x2e5   : >> { %v1028_v52 = vsel %vm1000_vm8, %v986_v23, %v974_v18 }
 0x2e6   : >> { %v1959_v26 = vpop.eup %1958 }
 0x2e7   : >> { %894 = vrot.lane.b32.xlu1 %v2182_v25, %s2196_s21  ;;  %989 = vrot.lane.b32.xlu0 %v1959_v26, %s2195_s20  ;;  %v878_v25 = vsub.s32 %v875_v34, %v877_v35  ;;  %s890_s20 = scalar_lea.vmem %s2814_s17, %s2186_s14 [#allocation8]  ;;  %s763_s14 = sadd.s32 1, %s2186_s14  }
 0x2e8   : >> { %p760_p8 = scmp.ge.s32.totalorder %s763_s14, 4  }
 0x2e9   : > { %vm1045_vm10 = vcmask (%p760_p8), 254976   ;;  %p1669_p9 = scmp.ne.s32.totalorder (%p760_p8), %s2158_s27, 1 }
 0x2eb   : >> { %1024 = vrot.lane.b32.xlu0 %v2174_v27, %s2196_s21 }
 0x2ef   : >> { %1034 = vrot.lane.b32.xlu0 %v898_v29, %s2196_s21 }
 0x355   : >> { %v859_v36 = vpop.permute.xlu1 %858 }
 0x356   : >> { %v861_v37 = vmul.f32 %v859_v36, %v839_v60 }
 0x358   : >> { %v870_v38 = vsel %vm869_vm7, %v861_v37, 0.0 }
 0x359   : >> { %v871_v39 = vpack.c.bf16 %v870_v38, %v870_v38  ;;  %v990_v40 = vpop.permute.xlu0 %989  ;;  %v895_v41 = vpop.permute.xlu1 %894 }
 0x35a   : >> { %v992_v42 = vmul.f32 %v990_v40, %v970_v11  ;;  %v897_v27 = vsel %vm869_vm7, %v861_v37, %v895_v41 }
 0x35b   : >> { %v879_v43 = vrot.slane %v871_v39, %v878_v25  ;;  %1030 = vrot.lane.b32.xlu1 %v897_v27, %s2193_s16 }
 0x35c   : >> { %v1001_v44 = vsel %vm1000_vm8, %v992_v42, 0.0 }
 0x35d   : >> { %v1002_v45 = vpack.c.bf16 %v1001_v44, %v1001_v44  ;;  %v1025_v46 = vpop.permute.xlu0 %1024  ;;  %v886_v47 = vrot.slane %v879_v43, %v878_v25 }
 0x35e   : >> { %v1027_v51 = vsel %vm1000_vm8, %v992_v42, %v1025_v46 }
 0x35f   : >> { %v1010_v48 = vrot.slane %v1002_v45, %v878_v25  ;;  %887 = vrot.lane.b32.xlu1 %v886_v47, %s2193_s16 }
 0x361   : >> { %v2554_v26 = vpop.permute.xlu0 %1034   ;;  %v1017_v50 = vrot.slane %v1010_v48, %v878_v25 }
 0x362   : >> { %v2850_v49 = vmov %v2554_v26 }
 0x363   : >> { %1018 = vrot.lane.b32.xlu0 %v1017_v50, %s2193_s16  ;;  %1038 = vrot.lane.b32.xlu1 %v1027_v51, %s2193_s16  ;;  %v2855_v26 = vmov %v2850_v49  ;;  %1047 = vst.msk [vmem:[#allocation5] sm:$0x3] (%p760_p8), %vm1045_vm10, %v2850_v49 }
 0x367   : >> { %1042 = vrot.lane.b32.xlu0 %v1028_v52, %s2196_s21 }
 0x3cd   : >> { %v1031_v53 = vpop.permute.xlu1 %1030  }
 0x3ce   : >> { %v2856_v25 = vmov %v1031_v53  ;;  %1046 = vst.msk [vmem:[#allocation4] sm:$0x3] (%p760_p8), %vm1045_vm10, %v1031_v53 }
 0x3d1   : >> { %v888_v54 = vpop.permute.xlu1 %887 }
 0x3d2   : >> { %892 = vst.msk [vmem:[%s890_s20] sm:$0x1] %vm891_vm9, %v888_v54 }
 0x3d5   : >> { %v1019_v55 = vpop.permute.xlu0 %1018  ;;  %v1039_v56 = vpop.permute.xlu1 %1038  }
 0x3d6   : >> { %1022 = vst.msk [vmem:[%s1021_s23] sm:$0x1] %vm891_vm9, %v1019_v55  ;;  %v2854_v27 = vmov %v1039_v56 }
 0x3d7   : > { %762 = sbr.rel (!%p760_p8) target bundleno = 273 (0x111), region = 167  ;;  %1048 = vst.msk [vmem:[#allocation6] sm:$0x3] (%p760_p8), %vm1045_vm10, %v1039_v56 }
 0x3d9   : >> { %v2565_v28 = vpop.permute.xlu0 %1042  }
 0x3da   : >> { %v2852_v57 = vmov %v2565_v28 }
 0x3db   : >> { %v2853_v28 = vmov %v2852_v57  ;;  %1049 = vst.msk [vmem:[#allocation7] sm:$0x3] (%p760_p8), %vm1045_vm10, %v2852_v57 }
 0x3dc   : > { %1053 = sbr.rel (%p1669_p9) target bundleno = 1211 (0x4bb), region = 87  ;;  %s2857_s16 = sld [smem:[#allocation35_spill]] (!%p1669_p9) }
 0x3e1   : > { %v1061_v58 = vld [vmem:[%s2794_s9 + $0x38] sm:$0xff]  ;;  %v2198_v1 = vmov 0.0   ;;  %v1060_v2 = vld [vmem:[%s2794_s9 + $0x30] sm:$0xff]  ;;  %v1059_v4 = vld [vmem:[%s2794_s9 + $0x28] sm:$0xff]  ;;  %vm2199_vm11 = vmmov 0  }
 0x3e2   : > { %v1057_v0 = vld [vmem:[%s2794_s9 + $0x18] sm:$0xff]  ;;  %1748 = vmatprep.subr.mxu0 %v2198_v1  ;;  %1759 = vmatprep.subr.mxu1 %v2198_v1  ;;  %v1056_v3 = vld [vmem:[%s2794_s9 + $0x10] sm:$0xff]  ;;  %v1055_v5 = vld [vmem:[%s2794_s9 + $0x8] sm:$0xff] }
 0x3e3   : > { %1749 = vmatpush3.msra.mxu0 %v1061_v58  ;;  %1760 = vmatpush3.msra.mxu1 %v1057_v0  ;;  %v1058_v6 = vld [vmem:[%s2794_s9 + $0x20] sm:$0xff]  ;;  %v1225_v8 = vld [vmem:[%s2796_s11 + $0x38] sm:$0xff]  ;;  %v1224_v10 = vld [vmem:[%s2796_s11 + $0x30] sm:$0xff] }
 0x3e4   : > { %1750 = vmatprep.subr.mxu0 %v2198_v1  ;;  %1761 = vmatprep.subr.mxu1 %v2198_v1  ;;  %v1054_v7 = vld [vmem:[%s2794_s9] sm:$0xff]  ;;  %v1221_v9 = vld [vmem:[%s2796_s11 + $0x18] sm:$0xff]  ;;  %v1220_v59 = vld [vmem:[%s2796_s11 + $0x10] sm:$0xff] }
 0x3e5   : > { %1751 = vmatpush3.msra.mxu0 %v1060_v2  ;;  %1762 = vmatpush3.msra.mxu1 %v1056_v3  ;;  %v1223_v60 = vld [vmem:[%s2796_s11 + $0x28] sm:$0xff]  ;;  %v1222_v62 = vld [vmem:[%s2796_s11 + $0x20] sm:$0xff] }
 0x3e6   : > { %1752 = vmatprep.subr.mxu0 %v2198_v1  ;;  %1763 = vmatprep.subr.mxu1 %v2198_v1  ;;  %v1219_v61 = vld [vmem:[%s2796_s11 + $0x8] sm:$0xff]  ;;  %v1218_v63 = vld [vmem:[%s2796_s11] sm:$0xff] }
 0x3e7   : > { %1753 = vmatpush3.msra.mxu0 %v1059_v4  ;;  %1764 = vmatpush3.msra.mxu1 %v1055_v5  ;;  %v1672_v13 = vld [vmem:[%s2795_s10] ss:$0 sm:$0xff] }
 0x3e8   : > { %1754 = vmatprep.subr.mxu0 %v2198_v1  ;;  %1765 = vmatprep.subr.mxu1 %v2198_v1  ;;  %v1675_v20 = vld [vmem:[%s2857_s16] ss:$0 sm:$0xff] }
 0x3e9   : > { %1755 = vmatpush3.msra.mxu0 %v1058_v6  ;;  %1756 = vmatprep.mubr.msk.f32.mxu0 %vm2199_vm11, %v2198_v1 }
 0x3ea   : > { %1766 = vmatpush3.msra.mxu1 %v1054_v7  ;;  %1767 = vmatprep.mubr.msk.f32.mxu1 %vm2199_vm11, %v2198_v1 }
 0x3eb   : > { %1757 = vmatmul.mubr.msk.f32.vlgmr.msra.gmra.mxu0 %vm791_vm4, %v1039_v56  ;;  %1768 = vmatmul.mubr.msk.f32.vlgmr.msra.gmra.mxu1 %vm791_vm4, %v1031_v53 }
 0x3ec   : > { %1770 = vmatprep.subr.mxu0 %v2198_v1  ;;  %1781 = vmatprep.subr.mxu1 %v2198_v1 }
 0x3ed   : > { %1771 = vmatpush3.msra.mxu0 %v1225_v8  ;;  %1782 = vmatpush3.msra.mxu1 %v1221_v9 }
 0x3ee   : > { %1772 = vmatprep.subr.mxu0 %v2198_v1  ;;  %1783 = vmatprep.subr.mxu1 %v2198_v1 }
 0x3ef   : > { %1773 = vmatpush3.msra.mxu0 %v1224_v10  ;;  %1784 = vmatpush3.msra.mxu1 %v1220_v59 }
 0x3f0   : > { %1774 = vmatprep.subr.mxu0 %v2198_v1  ;;  %1785 = vmatprep.subr.mxu1 %v2198_v1 }
 0x3f1   : > { %1775 = vmatpush3.msra.mxu0 %v1223_v60  ;;  %1786 = vmatpush3.msra.mxu1 %v1219_v61 }
 0x3f2   : > { %1776 = vmatprep.subr.mxu0 %v2198_v1  ;;  %1787 = vmatprep.subr.mxu1 %v2198_v1 }
 0x3f3   : > { %1777 = vmatpush3.msra.mxu0 %v1222_v62  ;;  %1778 = vmatprep.mubr.msk.f32.mxu0 %vm2199_vm11, %v2198_v1 }
 0x3f4   : > { %1788 = vmatpush3.msra.mxu1 %v1218_v63  ;;  %1789 = vmatprep.mubr.msk.f32.mxu1 %vm2199_vm11, %v2198_v1 }
 0x3f5   : > { %1779 = vmatmul.mubr.msk.f32.vlgmr.msra.gmra.mxu0 %vm791_vm4, %v2852_v57  ;;  %1790 = vmatmul.mubr.msk.f32.vlgmr.msra.gmra.mxu1 %vm791_vm4, %v2850_v49 }
 0x4ab   : > { %v1132_v11 = vpop.f32.mrf.mxu0  ;;  %v1205_v12 = vpop.f32.mrf.mxu1 }
 0x4ac   : > { %v1206_v14 = vadd.f32 %v1205_v12, %v1132_v11 }
 0x4ad   : > { %v1758_v15 = vpop.f32.mrf.mxu0  ;;  %v1769_v16 = vpop.f32.mrf.mxu1 }
 0x4ae   : > { %v1216_v17 = vadd.f32 %v1672_v13, %v1206_v14 }
 0x4b0   : > { %1217 = vst.msk [vmem:[#allocation12] sm:$0x3] %vm1045_vm10, %v1216_v17 }
 0x4b5   : > { %v1295_v18 = vpop.f32.mrf.mxu0  ;;  %v1368_v19 = vpop.f32.mrf.mxu1 }
 0x4b6   : > { %v1369_v21 = vadd.f32 %v1368_v19, %v1295_v18 }
 0x4b7   : > { %v1780_v22 = vpop.f32.mrf.mxu0  ;;  %v1791_v23 = vpop.f32.mrf.mxu1 }
 0x4b8   : > { %v1379_v24 = vadd.f32 %v1675_v20, %v1369_v21 }
 0x4ba   : > { %1380 = vst.msk [vmem:[#allocation13] sm:$0x3] %vm1045_vm10, %v1379_v24 }
 0x4bb PF: > { %s2858_s26 = sadd.s32 4294967295, %s2166_s29   ;;  %s1689_s21 = sshll.u32 %s2470_s18, 6 }
 0x4bc   : > { %s2655_s14 = sand.u32 1, %s2858_s26   ;;  %s2859_s3 = scalar_lea.vmem [#allocation10], %s2415_s12 }
 0x4bd   : > { %s1421_s13 = sshll.u32 %s2859_s3, 4  ;;  %s2860_s23 = sld [smem:[#allocation37_spill]]  ;;  %s2665_s13 = int_to_ptr.vmem [resolvable:$true] %s1421_s13 }
 0x4be   : > { %s1387_s1 = scalar_lea.sflag [#allocation11], %s2655_s14  ;;  %s1960_s2 = scalar_lea.vmem %s2665_s13, 64 }
 0x4bf   : > { %p1961_p10 = scmp.ne.s32.totalorder %s2665_s13, %s1960_s2  ;;  %s2200_s26 = smov [#allocation10]  }
 0x4c0   : > { %s1964_s18 = sshll.u32 %s2200_s26, 4  ;;  %s1965_s18 = int_to_ptr.vmem [resolvable:$false] %s1964_s18 }
 0x4c1   : > { %p1962_p12 = pnand %p1961_p10, %p2384_p11  ;;  %s1966_s12 = scalar_lea.vmem %s1965_s18, 128 }
 0x4c2   : > { %p1967_p1 = scmp.lt.s32.totalorder %s2665_s13, %s1965_s18  ;;  %p1968_p3 = scmp.lt.s32.totalorder %s1966_s12, %s1960_s2 }
 0x4c3   : > { %s2861_s16 = smov %s2860_s23  ;;  %s2663_s17 = scalar_lea.hbm %s2860_s23, %s1689_s21 }
 0x4c4   : > { %p1963_p0 = pneg %p1962_p12  ;;  %p1969_p5 = por %p1968_p3, %p1967_p1 }
 0x4c6   : > { %p1970_p6 = pnand %p1969_p5, %p1963_p0 }
 0x4c8   : > { %1973 = shalt.err (!%p1970_p6)
}
 0x4c9   : > { %s1974_s21 = scalar_lea.hbm %s2663_s17, 64  ;;  %s1978_s24 = scalar_lea.hbm %s2861_s16, 128 }
 0x4ca   : > { %p1975_p8 = scmp.ne.s32.totalorder %s2663_s17, %s1974_s21  ;;  %p1979_p10 = scmp.lt.s32.totalorder %s2663_s17, %s2861_s16 }
 0x4cb   : > { %p1980_p12 = scmp.lt.s32.totalorder %s1978_s24, %s1974_s21 }
 0x4cc   : > { %p1976_p9 = pnand %p1975_p8, %p2384_p11 }
 0x4cd   : > { %p1981_p0 = por %p1980_p12, %p1979_p10 }
 0x4ce   : > { %p1977_p13 = pneg %p1976_p9 }
 0x4d0   : > { %p1982_p1 = pnand %p1981_p0, %p1977_p13 }
 0x4d2   : > { %1985 = shalt.err (!%p1982_p1)
}
 0x4d3   : > { %s2201_s2 = smov 16   ;;  %s2202_s12 = smov 1  }
 0x4d4   : > { %1793 = dma.vmem_to_hbm [thread:$0]  (%p2384_p11), %s2665_s13, 64, %s2663_s17, %s1387_s1, %s2201_s2, %s2201_s2, %s2202_s12  }
 0x4d5   : > { %s1688_s21 = sshll.u32 %s2158_s27, 6  ;;  %s2863_s24 = sld [smem:[#allocation36_spill]] }
 0x4d6   : > { %s2865_s26 = scalar_lea.vmem [#allocation8], %s2413_s30  ;;  %s2866_s6 = sand.u32 1, %s2150_s25  }
 0x4d7   : > { %s1402_s5 = sshll.u32 %s2865_s26, 4  ;;  %s1382_s0 = scalar_lea.sflag [#allocation9], %s2866_s6  ;;  %s2701_s5 = int_to_ptr.vmem [resolvable:$true] %s1402_s5 }
 0x4d8   : > { %s1986_s7 = scalar_lea.vmem %s2701_s5, 64  ;;  %s2203_s1 = smov [#allocation8]  }
 0x4d9   : > { %p1987_p13 = scmp.ne.s32.totalorder %s2701_s5, %s1986_s7  ;;  %s1990_s27 = sshll.u32 %s2203_s1, 4  ;;  %s1991_s27 = int_to_ptr.vmem [resolvable:$false] %s1990_s27 }
 0x4da   : > { %s1992_s17 = scalar_lea.vmem %s1991_s27, 128  ;;  %p1993_p5 = scmp.lt.s32.totalorder %s2701_s5, %s1991_s27 }
 0x4db   : > { %s2864_s4 = smov %s2863_s24  ;;  %s2697_s23 = scalar_lea.hbm %s2863_s24, %s1688_s21 }
 0x4dc   : > { %p1988_p3 = pnand %p1987_p13, %p2354_p4  ;;  %p1994_p6 = scmp.lt.s32.totalorder %s1992_s17, %s1986_s7 }
 0x4de   : > { %p1989_p11 = pneg %p1988_p3  ;;  %p1995_p8 = por %p1994_p6, %p1993_p5 }
 0x4e0   : > { %p1996_p9 = pnand %p1995_p8, %p1989_p11 }
 0x4e2   : > { %1999 = shalt.err (!%p1996_p9)
}
 0x4e3   : > { %s2000_s30 = scalar_lea.hbm %s2697_s23, 64  ;;  %s2004_s13 = scalar_lea.hbm %s2864_s4, 128 }
 0x4e4   : > { %p2001_p10 = scmp.ne.s32.totalorder %s2697_s23, %s2000_s30  ;;  %p2005_p1 = scmp.lt.s32.totalorder %s2697_s23, %s2864_s4 }
 0x4e5   : > { %p2006_p13 = scmp.lt.s32.totalorder %s2004_s13, %s2000_s30 }
 0x4e6   : > { %p2002_p12 = pnand %p2001_p10, %p2354_p4 }
 0x4e7   : > { %p2007_p3 = por %p2006_p13, %p2005_p1 }
 0x4e8   : > { %p2003_p0 = pneg %p2002_p12 }
 0x4ea   : > { %p2008_p11 = pnand %p2007_p3, %p2003_p0 }
 0x4ec   : > { %2011 = shalt.err (!%p2008_p11)
}
 0x4ed   : > { %1792 = dma.vmem_to_hbm [thread:$0]  (%p2354_p4), %s2701_s5, 64, %s2697_s23, %s1382_s0, %s2201_s2, %s2201_s2, %s2202_s12  }
 0x4ee   : > { %s2204_s7 = smov [#allocation12]   ;;  %s2205_s24 = smov [#allocation13]  }
 0x4ef   : > { %s1437_s20 = sshll.u32 %s2204_s7, 4  ;;  %s1450_s26 = sshll.u32 %s2205_s24, 4  ;;  %s1438_s20 = int_to_ptr.vmem [resolvable:$true] %s1437_s20  ;;  %s1451_s26 = int_to_ptr.vmem [resolvable:$true] %s1450_s26 }
 0x4f0   : > { %s2012_s1 = scalar_lea.vmem %s1438_s20, 32  ;;  %p2019_p9 = scmp.lt.s32.totalorder %s1438_s20, %s1438_s20 }
 0x4f1   : > { %p2013_p5 = scmp.ne.s32.totalorder %s1438_s20, %s2012_s1  ;;  %p2020_p10 = scmp.lt.s32.totalorder %s2012_s1, %s2012_s1 }
 0x4f3   : > { %p2014_p6 = pnand %p2013_p5, %p2344_p2  ;;  %p2021_p12 = por %p2020_p10, %p2019_p9 }
 0x4f5   : > { %p2015_p8 = pneg %p2014_p6 }
 0x4f7   : > { %p2022_p0 = pnand %p2021_p12, %p2015_p8 }
 0x4f9   : > { %2025 = shalt.err (!%p2022_p0)
}
 0x4fa   : > { %s2867_s2 = sld [smem:[#allocation38_spill]]  ;;  %s2036_s12 = scalar_lea.vmem %s1451_s26, 32 }
 0x4fb   : > { %p2037_p4 = scmp.ne.s32.totalorder %s1451_s26, %s2036_s12  ;;  %p2043_p3 = scmp.lt.s32.totalorder %s1451_s26, %s1451_s26 }
 0x4fc   : > { %p2044_p11 = scmp.lt.s32.totalorder %s2036_s12, %s2036_s12 }
 0x4fd   : > { %p2038_p1 = pnand %p2037_p4, %p2344_p2 }
 0x4fe   : > { %p2045_p5 = por %p2044_p11, %p2043_p3 }
 0x4ff   : > { %p2039_p13 = pneg %p2038_p1 }
 0x500   : > { %1795 = dma.vmem_to_hbm [thread:$0]  (%p2344_p2), %s1438_s20, 32, %s2867_s2, [#allocation11]  }
 0x501   : > { %p2046_p6 = pnand %p2045_p5, %p2039_p13 }
 0x503   : > { %2049 = shalt.err (!%p2046_p6)
}
 0x504   : > { %s2868_s27 = sld [smem:[#allocation39_spill]] }
 0x50a   : > { %1797 = dma.vmem_to_hbm [thread:$0]  (%p2344_p2), %s1451_s26, 32, %s2868_s27, [#allocation14]  }
 0x50b   : > { %2117 = dma.done.wait (%p2344_p2), [#allocation11], 32  }
 0x50c   : > { %2119 = vsyncadd (%p2344_p2), [#allocation11], 4294967264 }
 0x50d   : > { %2121 = dma.done.wait (%p2344_p2), [#allocation14], 32  }
 0x50e   : > { %2123 = vsyncadd (%p2344_p2), [#allocation14], 4294967264 }
 0x50f PF: > { %s2869_s17 = sld [smem:[#allocation20_spill]]  ;;  %p1815_p8 = scmp.ge.s32.totalorder %s2166_s29, 2 }
 0x511   : > { %p1805_p9 = pnand %p1815_p8, %p2369_p7 }
 0x513   : > { %p1806_p10 = pneg %p1805_p9 }
 0x515   : > { %s1470_s30 = sand.u32 1, %s2869_s17  }
 0x516   : > { %s1471_s6 = scalar_lea.sflag [#allocation9], %s1470_s30 }
 0x517   : > { %2125 = dma.done.wait (%p1806_p10), %s1471_s6, 64  }
 0x518   : > { %2127 = vsyncadd (%p1806_p10), %s1471_s6, 4294967232  ;;  %s2870_s14 = sadd.s32 4294967294, %s2166_s29   ;;  %p2871_p12 = scmp.ne.s32.totalorder %s2841_s28, 0 }
 0x519   : > { %s1479_s13 = sand.u32 1, %s2870_s14  }
 0x51a   : > { %p1808_p0 = pnand %p1815_p8, %p2871_p12  ;;  %s1480_s19 = scalar_lea.sflag [#allocation11], %s1479_s13 }
 0x51c   : > { %p1809_p4 = pneg %p1808_p0 }
 0x51e   : > { %2129 = dma.done.wait (%p1809_p4), %s1480_s19, 64  }
 0x51f   : > { %2131 = vsyncadd (%p1809_p4), %s1480_s19, 4294967232  ;;  %s34_s29 = sadd.s32 1, %s2166_s29   ;;  %s2872_s15 = sld [smem:[#allocation19_spill]] }
 0x520   : > { %p31_p2 = scmp.ge.s32.totalorder %s34_s29, 4   ;;  %s2873_s23 = sld [smem:[#allocation26_spill]] }
 0x521   : > { %s2874_s3 = sld [smem:[#allocation21_spill]]  ;;  %s2878_s21 = smov %s2138_s22 }
 0x522   : > { %s2875_s26 = sld [smem:[#allocation25_spill]]  ;;  %s2880_s24 = smov %s2150_s25 }
 0x523   : > { %s2876_s27 = sld [smem:[#allocation22_spill]]  ;;  %33 = sbr.rel (!%p31_p2) target bundleno = 23 (0x17), region = 178 }
 0x524   : > { %s2877_s28 = sld [smem:[#allocation23_spill]] }
 0x525   : > { %s2879_s22 = smov %s2872_s15 }
 0x527   : > { %s2881_s25 = smov %s2874_s3 }
 0x528   :  { %1485 = vsyncpa [#allocation9], 1 }
 0x529   :  { %1487 = vsyncpa [#allocation9 + $0x1], 1 }
 0x52a   :  { %1488 = vsyncpa [#allocation11], 1 }
 0x52b   :  { %1490 = vsyncpa [#allocation11 + $0x1], 1 }
 0x52c   :  { %1491 = vsyncpa [#allocation14], 1 }

</bundles_post_ra>
